<compile_context>
chip_gen: v5e
topology: v5e:2x2
jax: 0.10.0
libtpu: 0.0.40
codegen_flags: <defaults>
</compile_context>

<pallas_src>
import numpy as np
import jax
import jax.numpy as jnp
from jax import lax
from jax.experimental import pallas as pl
from jax.experimental.pallas import tpu as pltpu

F32 = jnp.float32
BF16 = jnp.bfloat16


def _largest_divisor_leq(n, target):
    target = max(1, min(int(n), int(target)))
    for d in range(target, 0, -1):
        if n % d == 0:
            return d
    return 1


# ----------------------------------------------------------------------------- kernels
def _encoder_kernel(xf_ref, xb_ref, wif_ref, whf_ref, bf_ref, wib_ref, whb_ref, bb_ref,
                    outf_ref, outb_ref, hn_ref, cn_ref,
                    hf_ref, cf_ref, hb_ref, cb_ref, xgf_ref, xgb_ref):
    """Single-layer bidirectional LSTM (PyTorch gate order i,f,g,o), zero initial state.

    One grid step processes one time-chunk: the forward direction sees chunks in
    ascending order, the backward direction sees them in descending order (via the
    BlockSpec index maps) and walks each chunk back-to-front.  The recurrent h/c of
    both directions are carried across grid steps in VMEM scratch.
    """
    TC, B, E = xf_ref.shape          # time-chunk, batch, embed
    H2 = whf_ref.shape[0]            # per-direction hidden size

    @pl.when(pl.program_id(0) == 0)
    def _init():
        hf_ref[...] = jnp.zeros_like(hf_ref)
        cf_ref[...] = jnp.zeros_like(cf_ref)
        hb_ref[...] = jnp.zeros_like(hb_ref)
        cb_ref[...] = jnp.zeros_like(cb_ref)

    # Hoist the input projections of the whole chunk into two big MXU matmuls
    # (bf16 operands, f32 accumulate); only h @ W_hh stays inside the recurrence.
    xf = xf_ref[...].reshape(TC * B, E).astype(BF16)
    xb = xb_ref[...].reshape(TC * B, E).astype(BF16)
    xgf_ref[...] = jnp.dot(xf, wif_ref[...], preferred_element_type=F32) + bf_ref[...]
    xgb_ref[...] = jnp.dot(xb, wib_ref[...], preferred_element_type=F32) + bb_ref[...]

    whf = whf_ref[...]               # (H2, 4*H2) bf16
    whb = whb_ref[...]

    def lstm_gates(gates, c):
        # TODO(synk): at toy H2=16 these gate slices are sub-lane (<128); for real model
        # sizes pick H2 as a multiple of 128 so the slices are free lane-aligned views.
        i_g = jax.nn.sigmoid(gates[:, 0:H2])
        f_g = jax.nn.sigmoid(gates[:, H2:2 * H2])
        g_g = jnp.tanh(gates[:, 2 * H2:3 * H2])
        o_g = jax.nn.sigmoid(gates[:, 3 * H2:4 * H2])
        c2 = f_g * c + i_g * g_g
        h2 = o_g * jnp.tanh(c2)
        return h2, c2

    def step(t, carry):
        hf, cf, hb, cb = carry
        # forward direction: local time t (chunks ascend with the grid)
        rf = pl.multiple_of(t * B, B)
        gf = xgf_ref[pl.ds(rf, B), :] + jnp.dot(
            hf.astype(BF16), whf, preferred_element_type=F32)
        hf2, cf2 = lstm_gates(gf, cf)
        outf_ref[t] = hf2
        # backward direction: local time TC-1-t (chunks descend with the grid)
        tb = TC - 1 - t
        rb = pl.multiple_of(tb * B, B)
        gb = xgb_ref[pl.ds(rb, B), :] + jnp.dot(
            hb.astype(BF16), whb, preferred_element_type=F32)
        hb2, cb2 = lstm_gates(gb, cb)
        outb_ref[tb] = hb2
        return hf2, cf2, hb2, cb2

    unroll = True if TC <= 8 else 4
    hf, cf, hb, cb = lax.fori_loop(
        0, TC, step, (hf_ref[...], cf_ref[...], hb_ref[...], cb_ref[...]),
        unroll=unroll)

    # carry the recurrent state across grid steps
    hf_ref[...] = hf
    cf_ref[...] = cf
    hb_ref[...] = hb
    cb_ref[...] = cb

    # final states: e_h[0]=forward final, e_h[1]=backward final.  The h_n/c_n output
    # blocks are resident across the ("arbitrary") grid axis; the value after the last
    # grid step is what gets written back.
    hn_ref[0] = hf
    hn_ref[1] = hb
    cn_ref[0] = cf
    cn_ref[1] = cb


def _decoder_head_kernel(bout_ref, out_ref):
    """Hoisted, loop-invariant decoder output head.

    In the reference module decoder_out = dropout(attn_vector) where attn_vector is
    never updated from zeros, so logits == b_out and every timestep / batch row of
    sys_out_batch equals log_softmax(b_out).  The per-step LSTMCell, attention softmax,
    context bmm and greedy re-embedding have no effect on the returned tensor, so they
    are removed and log_softmax(b_out) is broadcast-stored, tiled over T.
    """
    TB, B, V = out_ref.shape
    logits = bout_ref[...]                                   # (1, V) f32
    m = jnp.max(logits, axis=1, keepdims=True)
    z = logits - m
    logp = z - jnp.log(jnp.sum(jnp.exp(z), axis=1, keepdims=True))   # (1, V)
    out_ref[...] = jnp.broadcast_to(logp[None, :, :], (TB, B, V))


# ----------------------------------------------------------------------------- wrappers
def _const_spec(arr):
    """Full-array block with a constant index map (kept VMEM-resident across the grid)."""
    nd = arr.ndim
    return pl.BlockSpec(arr.shape, lambda i, _nd=nd: (0,) * _nd)


def run_encoder(src_emb, p, time_chunk=32):
    L, B, E = src_emb.shape
    H2 = p['w_hh_f'].shape[1]
    TC = _largest_divisor_leq(L, time_chunk)
    NC = L // TC

    # Pre-transposed weights; matmul operands in bf16 (f32 accumulate in-kernel).
    wif = p['w_ih_f'].T.astype(BF16)                  # (E, 4*H2)
    whf = p['w_hh_f'].T.astype(BF16)                  # (H2, 4*H2)
    bf = (p['b_ih_f'] + p['b_hh_f']).reshape(1, -1).astype(F32)
    wib = p['w_ih_b'].T.astype(BF16)
    whb = p['w_hh_b'].T.astype(BF16)
    bb = (p['b_ih_b'] + p['b_hh_b']).reshape(1, -1).astype(F32)

    x = src_emb.astype(F32)

    out_f, out_b, h_n, c_n = pl.pallas_call(
        _encoder_kernel,
        out_shape=(jax.ShapeDtypeStruct((L, B, H2), F32),
                   jax.ShapeDtypeStruct((L, B, H2), F32),
                   jax.ShapeDtypeStruct((2, B, H2), F32),
                   jax.ShapeDtypeStruct((2, B, H2), F32)),
        grid=(NC,),
        in_specs=[
            pl.BlockSpec((TC, B, E), lambda i: (i, 0, 0)),             # forward chunks
            pl.BlockSpec((TC, B, E), lambda i: (NC - 1 - i, 0, 0)),    # backward chunks
            _const_spec(wif), _const_spec(whf), _const_spec(bf),
            _const_spec(wib), _const_spec(whb), _const_spec(bb),
        ],
        out_specs=(
            pl.BlockSpec((TC, B, H2), lambda i: (i, 0, 0)),
            pl.BlockSpec((TC, B, H2), lambda i: (NC - 1 - i, 0, 0)),
            pl.BlockSpec((2, B, H2), lambda i: (0, 0, 0)),
            pl.BlockSpec((2, B, H2), lambda i: (0, 0, 0)),
        ),
        scratch_shapes=[
            pltpu.VMEM((B, H2), F32), pltpu.VMEM((B, H2), F32),        # h_f, c_f carries
            pltpu.VMEM((B, H2), F32), pltpu.VMEM((B, H2), F32),        # h_b, c_b carries
            pltpu.VMEM((TC * B, 4 * H2), F32),                         # chunk input gates fwd
            pltpu.VMEM((TC * B, 4 * H2), F32),                         # chunk input gates bwd
        ],
        compiler_params=pltpu.CompilerParams(
            dimension_semantics=("arbitrary",),        # carried recurrence across chunks
            vmem_limit_bytes=32 * 1024 * 1024),
    )(x, x, wif, whf, bf, wib, whb, bb)

    enc_out = jnp.concatenate([out_f, out_b], axis=2)                   # (L, B, H)
    # e_h_ = cat([e_h[0::2], e_h[1::2]], 2).squeeze(0); same for e_c_
    d_h0 = jnp.concatenate([h_n[0], h_n[1]], axis=1)                    # (B, H)
    d_c0 = jnp.concatenate([c_n[0], c_n[1]], axis=1)
    return enc_out, d_h0, d_c0


def run_decoder(tgt_len, batch_size, p, t_chunk=32):
    T, B = int(tgt_len), int(batch_size)
    V = p['b_out'].shape[0]
    TT = _largest_divisor_leq(T, t_chunk)
    NT = T // TT
    bout = p['b_out'].reshape(1, V).astype(F32)

    # TODO(synk): at real vocab sizes pad V up to a multiple of 128 (lane-dense stores)
    # and shrink the T-chunk so each (TT, B, V) output block stays well inside VMEM.
    return pl.pallas_call(
        _decoder_head_kernel,
        out_shape=jax.ShapeDtypeStruct((T, B, V), F32),
        grid=(NT,),
        in_specs=[pl.BlockSpec((1, V), lambda i: (0, 0))],
        out_specs=pl.BlockSpec((TT, B, V), lambda i: (i, 0, 0)),
        compiler_params=pltpu.CompilerParams(
            dimension_semantics=("parallel",)),
    )(bout)


def nmt_forward(params, src_batch, tgt_batch, is_train, bos_id,
                enc_time_chunk=32, dec_t_chunk=32):
    # Embedding gather stays in plain JAX (glue).
    src_emb = jnp.take(params['src_emb'], src_batch, axis=0)            # (Ls, B, E)
    enc_out, d_h0, d_c0 = run_encoder(src_emb, params, enc_time_chunk)
    # TODO(synk): enc_out / d_h0 / d_c0 feed only dead compute in the reference decoder
    # (attention context and LSTMCell state never reach sys_out_batch because
    # attn_vector stays zero); that dead per-step work was removed per the perf review.
    # is_train / bos_id only influenced the (dead) next-input selection, and train-mode
    # dropout acts on an all-zero attn_vector, so neither changes the returned tensor —
    # exactly as in the reference module.
    del enc_out, d_h0, d_c0, is_train, bos_id
    T, B = tgt_batch.shape
    return run_decoder(T, B, params, dec_t_chunk)                       # (T, B, V)


# ----------------------------------------------------------------------------- reference
def encoder_reference(src_emb, p):
    """Pure-JAX bidirectional LSTM reference (same bf16 matmul casts as the kernel)."""
    H2 = p['w_hh_f'].shape[1]
    x = src_emb.astype(F32)

    def run_dir(x_seq, wi, wh, b_ih, b_hh):
        wi_t = wi.T.astype(BF16)
        wh_t = wh.T.astype(BF16)
        b = (b_ih + b_hh).reshape(1, -1).astype(F32)

        def cell(carry, x_t):
            h, c = carry
            gates = (jnp.dot(x_t.astype(BF16), wi_t, preferred_element_type=F32) + b
                     + jnp.dot(h.astype(BF16), wh_t, preferred_element_type=F32))
            i = jax.nn.sigmoid(gates[:, 0:H2])
            f = jax.nn.sigmoid(gates[:, H2:2 * H2])
            g = jnp.tanh(gates[:, 2 * H2:3 * H2])
            o = jax.nn.sigmoid(gates[:, 3 * H2:4 * H2])
            c2 = f * c + i * g
            h2 = o * jnp.tanh(c2)
            return (h2, c2), h2

        B = x_seq.shape[1]
        init = (jnp.zeros((B, H2), F32), jnp.zeros((B, H2), F32))
        (hn, cn), ys = lax.scan(cell, init, x_seq)
        return ys, hn, cn

    out_f, hf, cf = run_dir(x, p['w_ih_f'], p['w_hh_f'], p['b_ih_f'], p['b_hh_f'])
    out_b_rev, hb, cb = run_dir(x[::-1], p['w_ih_b'], p['w_hh_b'], p['b_ih_b'], p['b_hh_b'])
    out_b = out_b_rev[::-1]
    enc_out = jnp.concatenate([out_f, out_b], axis=2)
    d_h0 = jnp.concatenate([hf, hb], axis=1)
    d_c0 = jnp.concatenate([cf, cb], axis=1)
    return enc_out, d_h0, d_c0


# ----------------------------------------------------------------------------- params
def init_params(key, src_vocab, tgt_vocab, E, H):
    """All parameters ~ U(-0.1, 0.1), matching NMT.reset_parameters()."""
    H2 = H // 2

    def u(k, shape):
        return jax.random.uniform(k, shape, F32, minval=-0.1, maxval=0.1)

    ks = jax.random.split(key, 17)
    p = {
        'src_emb':   u(ks[0],  (src_vocab, E)),
        # encoder bidirectional LSTM, layer 0
        'w_ih_f':    u(ks[1],  (4 * H2, E)),
        'w_hh_f':    u(ks[2],  (4 * H2, H2)),
        'b_ih_f':    u(ks[3],  (4 * H2,)),
        'b_hh_f':    u(ks[4],  (4 * H2,)),
        'w_ih_b':    u(ks[5],  (4 * H2, E)),
        'w_hh_b':    u(ks[6],  (4 * H2, H2)),
        'b_ih_b':    u(ks[7],  (4 * H2,)),
        'b_hh_b':    u(ks[8],  (4 * H2,)),
        # decoder (LSTMCell / attention params kept for parity with the module even
        # though they no longer reach the returned output — see nmt_forward note).
        'dec_emb':   u(ks[9],  (tgt_vocab, E)),
        'w_ih_cell': u(ks[10], (4 * H, E + H)),
        'w_hh_cell': u(ks[11], (4 * H, H)),
        'b_ih_cell': u(ks[12], (4 * H,)),
        'b_hh_cell': u(ks[13], (4 * H,)),
        'w_attn':    u(ks[14], (H, H)),          # Attn 'general', no bias
        'w_out':     u(ks[15], (tgt_vocab, H)),
        'b_out':     u(ks[16], (tgt_vocab,)),
        # NOTE: decoder.concat (Linear(2H, H)) exists in __init__ but is unused in forward.
    }
    return p


# ----------------------------------------------------------------------------- main
if __name__ == "__main__":
    SRC_V, TGT_V = 20, 16
    EMB, HID = 16, 32
    SRC_L, TGT_L, BATCH = 6, 8, 2
    BOS_ID = 2          # stand-in for tgt_vocab.stoi['<s>']

    key = jax.random.PRNGKey(0)
    kp, ksrc, ktgt = jax.random.split(key, 3)
    params = init_params(kp, SRC_V, TGT_V, EMB, HID)
    src_batch = jax.random.randint(ksrc, (SRC_L, BATCH), 0, SRC_V)       # (src_len, batch)
    tgt_batch = jax.random.randint(ktgt, (TGT_L, BATCH), 0, TGT_V)       # (tgt_len, batch)

    # Chunk sizes chosen so both grids take multiple steps at these toy shapes
    # (exercises the carried-state / tiled-output paths).
    out_train = nmt_forward(params, src_batch, tgt_batch, True, BOS_ID,
                            enc_time_chunk=3, dec_t_chunk=4)
    out_infer = nmt_forward(params, src_batch, tgt_batch, False, BOS_ID,
                            enc_time_chunk=3, dec_t_chunk=4)

    # Encoder kernel vs pure-JAX reference (same bf16 matmul casts).
    src_emb = jnp.take(params['src_emb'], src_batch, axis=0)
    enc_out, d_h0, d_c0 = run_encoder(src_emb, params, time_chunk=3)
    ref_enc, ref_h0, ref_c0 = encoder_reference(src_emb, params)

    jax.block_until_ready((out_train, out_infer, enc_out, d_h0, d_c0))

    # Per the reference module, attn_vector is never updated from zeros, so every
    # step's decoder output equals log_softmax(out.bias) broadcast over batch.
    expected = jnp.broadcast_to(jax.nn.log_softmax(params['b_out']),
                                (TGT_L, BATCH, TGT_V))
    assert out_train.shape == (TGT_L, BATCH, TGT_V)
    assert out_infer.shape == (TGT_L, BATCH, TGT_V)
    assert np.allclose(np.asarray(out_train), np.asarray(expected), atol=1e-5)
    assert np.allclose(np.asarray(out_infer), np.asarray(expected), atol=1e-5)
    assert np.allclose(np.asarray(enc_out), np.asarray(ref_enc), atol=2e-5)
    assert np.allclose(np.asarray(d_h0), np.asarray(ref_h0), atol=2e-5)
    assert np.allclose(np.asarray(d_c0), np.asarray(ref_c0), atol=2e-5)
    print("KERNEL_OK")
</pallas_src>

<mosaic_0001>
module attributes {stable_mosaic.version = 11 : i64} {
  func.func @_encoder_kernel(%arg0: i32, %arg1: memref<3x2x16xf32, #tpu.memory_space<vmem>>, %arg2: memref<3x2x16xf32, #tpu.memory_space<vmem>>, %arg3: memref<16x64xbf16, #tpu.memory_space<vmem>>, %arg4: memref<16x64xbf16, #tpu.memory_space<vmem>>, %arg5: memref<1x64xf32, #tpu.memory_space<vmem>>, %arg6: memref<16x64xbf16, #tpu.memory_space<vmem>>, %arg7: memref<16x64xbf16, #tpu.memory_space<vmem>>, %arg8: memref<1x64xf32, #tpu.memory_space<vmem>>, %arg9: memref<3x2x16xf32, #tpu.memory_space<vmem>>, %arg10: memref<3x2x16xf32, #tpu.memory_space<vmem>>, %arg11: memref<2x2x16xf32, #tpu.memory_space<vmem>>, %arg12: memref<2x2x16xf32, #tpu.memory_space<vmem>>, %arg13: memref<2x16xf32, #tpu.memory_space<vmem>>, %arg14: memref<2x16xf32, #tpu.memory_space<vmem>>, %arg15: memref<2x16xf32, #tpu.memory_space<vmem>>, %arg16: memref<2x16xf32, #tpu.memory_space<vmem>>, %arg17: memref<6x64xf32, #tpu.memory_space<vmem>>, %arg18: memref<6x64xf32, #tpu.memory_space<vmem>>) attributes {dimension_semantics = [#tpu.dimension_semantics<arbitrary>], iteration_bounds = array<i64: 2>, scalar_prefetch = 0 : i64, scratch_operands = 6 : i64, tpu.core_type = #tpu.core_type<tc>, window_params = [{transform_indices = @transform_0, window_bounds = array<i64: 3, 2, 16>}, {transform_indices = @transform_1, window_bounds = array<i64: 3, 2, 16>}, {pipeline_mode = #tpu.pipeline_mode<synchronous>, transform_indices = @transform_2, window_bounds = array<i64: 16, 64>}, {pipeline_mode = #tpu.pipeline_mode<synchronous>, transform_indices = @transform_3, window_bounds = array<i64: 16, 64>}, {pipeline_mode = #tpu.pipeline_mode<synchronous>, transform_indices = @transform_4, window_bounds = array<i64: 1, 64>}, {pipeline_mode = #tpu.pipeline_mode<synchronous>, transform_indices = @transform_5, window_bounds = array<i64: 16, 64>}, {pipeline_mode = #tpu.pipeline_mode<synchronous>, transform_indices = @transform_6, window_bounds = array<i64: 16, 64>}, {pipeline_mode = #tpu.pipeline_mode<synchronous>, transform_indices = @transform_7, window_bounds = array<i64: 1, 64>}, {transform_indices = @transform_8, window_bounds = array<i64: 3, 2, 16>}, {transform_indices = @transform_9, window_bounds = array<i64: 3, 2, 16>}, {pipeline_mode = #tpu.pipeline_mode<synchronous>, transform_indices = @transform_10, window_bounds = array<i64: 2, 2, 16>}, {pipeline_mode = #tpu.pipeline_mode<synchronous>, transform_indices = @transform_11, window_bounds = array<i64: 2, 2, 16>}]} {
    %c0_i32 = arith.constant 0 : i32
    %0 = arith.cmpi eq, %arg0, %c0_i32 : i32
    %1 = arith.extui %0 : i1 to i32
    %c0_i32_0 = arith.constant 0 : i32
    %2 = arith.cmpi ne, %1, %c0_i32_0 : i32
    scf.if %2 {
      %cst_102 = arith.constant 0.000000e+00 : f32
      %262 = vector.broadcast %cst_102 : f32 to vector<2x16xf32>
      %c0_103 = arith.constant 0 : index
      %c0_104 = arith.constant 0 : index
      %263 = vector.load %arg13[%c0_103, %c0_104] : memref<2x16xf32, #tpu.memory_space<vmem>>, vector<2x16xf32>
      tpu.vector_store %arg13[%c0_103, %c0_104], %262 {strides = array<i32>} : memref<2x16xf32, #tpu.memory_space<vmem>>, vector<2x16xf32>,
      %cst_105 = arith.constant 0.000000e+00 : f32
      %264 = vector.broadcast %cst_105 : f32 to vector<2x16xf32>
      %c0_106 = arith.constant 0 : index
      %c0_107 = arith.constant 0 : index
      %265 = vector.load %arg14[%c0_106, %c0_107] : memref<2x16xf32, #tpu.memory_space<vmem>>, vector<2x16xf32>
      tpu.vector_store %arg14[%c0_106, %c0_107], %264 {strides = array<i32>} : memref<2x16xf32, #tpu.memory_space<vmem>>, vector<2x16xf32>,
      %cst_108 = arith.constant 0.000000e+00 : f32
      %266 = vector.broadcast %cst_108 : f32 to vector<2x16xf32>
      %c0_109 = arith.constant 0 : index
      %c0_110 = arith.constant 0 : index
      %267 = vector.load %arg15[%c0_109, %c0_110] : memref<2x16xf32, #tpu.memory_space<vmem>>, vector<2x16xf32>
      tpu.vector_store %arg15[%c0_109, %c0_110], %266 {strides = array<i32>} : memref<2x16xf32, #tpu.memory_space<vmem>>, vector<2x16xf32>,
      %cst_111 = arith.constant 0.000000e+00 : f32
      %268 = vector.broadcast %cst_111 : f32 to vector<2x16xf32>
      %c0_112 = arith.constant 0 : index
      %c0_113 = arith.constant 0 : index
      %269 = vector.load %arg16[%c0_112, %c0_113] : memref<2x16xf32, #tpu.memory_space<vmem>>, vector<2x16xf32>
      tpu.vector_store %arg16[%c0_112, %c0_113], %268 {strides = array<i32>} : memref<2x16xf32, #tpu.memory_space<vmem>>, vector<2x16xf32>,
    } else {
    }
    %c0 = arith.constant 0 : index
    %c0_1 = arith.constant 0 : index
    %c0_2 = arith.constant 0 : index
    %3 = vector.load %arg1[%c0, %c0_1, %c0_2] : memref<3x2x16xf32, #tpu.memory_space<vmem>>, vector<3x2x16xf32>
    %4 = vector.shape_cast %3 : vector<3x2x16xf32> to vector<6x16xf32>
    %5 = arith.truncf %4 : vector<6x16xf32> to vector<6x16xbf16>
    %c0_3 = arith.constant 0 : index
    %c0_4 = arith.constant 0 : index
    %c0_5 = arith.constant 0 : index
    %6 = vector.load %arg2[%c0_3, %c0_4, %c0_5] : memref<3x2x16xf32, #tpu.memory_space<vmem>>, vector<3x2x16xf32>
    %7 = vector.shape_cast %6 : vector<3x2x16xf32> to vector<6x16xf32>
    %8 = arith.truncf %7 : vector<6x16xf32> to vector<6x16xbf16>
    %c0_6 = arith.constant 0 : index
    %c0_7 = arith.constant 0 : index
    %9 = vector.load %arg3[%c0_6, %c0_7] : memref<16x64xbf16, #tpu.memory_space<vmem>>, vector<16x64xbf16>
    %cst = arith.constant dense<0.000000e+00> : vector<6x64xf32>
    %10 = tpu.matmul %5, %9, %cst {dimension_numbers = #tpu.dot_dimension_numbers<[1], [0], [0], [1], [0, 0, 1, 1], [], []>} : vector<6x16xbf16>, vector<16x64xbf16>, vector<6x64xf32> -> vector<6x64xf32>
    %c0_8 = arith.constant 0 : index
    %c0_9 = arith.constant 0 : index
    %11 = vector.load %arg5[%c0_8, %c0_9] : memref<1x64xf32, #tpu.memory_space<vmem>>, vector<1x64xf32>
    %12 = vector.broadcast %11 : vector<1x64xf32> to vector<6x64xf32>
    %13 = arith.addf %10, %12 : vector<6x64xf32>
    %c0_10 = arith.constant 0 : index
    %c0_11 = arith.constant 0 : index
    %14 = vector.load %arg17[%c0_10, %c0_11] : memref<6x64xf32, #tpu.memory_space<vmem>>, vector<6x64xf32>
    tpu.vector_store %arg17[%c0_10, %c0_11], %13 {strides = array<i32>} : memref<6x64xf32, #tpu.memory_space<vmem>>, vector<6x64xf32>,
    %c0_12 = arith.constant 0 : index
    %c0_13 = arith.constant 0 : index
    %15 = vector.load %arg6[%c0_12, %c0_13] : memref<16x64xbf16, #tpu.memory_space<vmem>>, vector<16x64xbf16>
    %cst_14 = arith.constant dense<0.000000e+00> : vector<6x64xf32>
    %16 = tpu.matmul %8, %15, %cst_14 {dimension_numbers = #tpu.dot_dimension_numbers<[1], [0], [0], [1], [0, 0, 1, 1], [], []>} : vector<6x16xbf16>, vector<16x64xbf16>, vector<6x64xf32> -> vector<6x64xf32>
    %c0_15 = arith.constant 0 : index
    %c0_16 = arith.constant 0 : index
    %17 = vector.load %arg8[%c0_15, %c0_16] : memref<1x64xf32, #tpu.memory_space<vmem>>, vector<1x64xf32>
    %18 = vector.broadcast %17 : vector<1x64xf32> to vector<6x64xf32>
    %19 = arith.addf %16, %18 : vector<6x64xf32>
    %c0_17 = arith.constant 0 : index
    %c0_18 = arith.constant 0 : index
    %20 = vector.load %arg18[%c0_17, %c0_18] : memref<6x64xf32, #tpu.memory_space<vmem>>, vector<6x64xf32>
    tpu.vector_store %arg18[%c0_17, %c0_18], %19 {strides = array<i32>} : memref<6x64xf32, #tpu.memory_space<vmem>>, vector<6x64xf32>,
    %c0_19 = arith.constant 0 : index
    %c0_20 = arith.constant 0 : index
    %21 = vector.load %arg4[%c0_19, %c0_20] : memref<16x64xbf16, #tpu.memory_space<vmem>>, vector<16x64xbf16>
    %c0_21 = arith.constant 0 : index
    %c0_22 = arith.constant 0 : index
    %22 = vector.load %arg7[%c0_21, %c0_22] : memref<16x64xbf16, #tpu.memory_space<vmem>>, vector<16x64xbf16>
    %c0_23 = arith.constant 0 : index
    %c0_24 = arith.constant 0 : index
    %23 = vector.load %arg13[%c0_23, %c0_24] : memref<2x16xf32, #tpu.memory_space<vmem>>, vector<2x16xf32>
    %c0_25 = arith.constant 0 : index
    %c0_26 = arith.constant 0 : index
    %24 = vector.load %arg14[%c0_25, %c0_26] : memref<2x16xf32, #tpu.memory_space<vmem>>, vector<2x16xf32>
    %c0_27 = arith.constant 0 : index
    %c0_28 = arith.constant 0 : index
    %25 = vector.load %arg15[%c0_27, %c0_28] : memref<2x16xf32, #tpu.memory_space<vmem>>, vector<2x16xf32>
    %c0_29 = arith.constant 0 : index
    %c0_30 = arith.constant 0 : index
    %26 = vector.load %arg16[%c0_29, %c0_30] : memref<2x16xf32, #tpu.memory_space<vmem>>, vector<2x16xf32>
    %c0_i32_31 = arith.constant 0 : i32
    %c2_i32 = arith.constant 2 : i32
    %27 = arith.muli %c0_i32_31, %c2_i32 : i32
    %28 = tpu.assume_multiple %27, 2 : i32
    %29 = arith.index_cast %28 : i32 to index
    %c0_32 = arith.constant 0 : index
    %30 = vector.load %arg17[%29, %c0_32] : memref<6x64xf32, #tpu.memory_space<vmem>>, vector<2x64xf32>
    %31 = arith.truncf %23 : vector<2x16xf32> to vector<2x16xbf16>
    %cst_33 = arith.constant dense<0.000000e+00> : vector<2x64xf32>
    %32 = tpu.matmul %31, %21, %cst_33 {dimension_numbers = #tpu.dot_dimension_numbers<[1], [0], [0], [1], [0, 0, 1, 1], [], []>} : vector<2x16xbf16>, vector<16x64xbf16>, vector<2x64xf32> -> vector<2x64xf32>
    %33 = arith.addf %30, %32 : vector<2x64xf32>
    %34 = vector.extract_strided_slice %33 {offsets = [0, 0], sizes = [2, 16], strides = [1, 1]} : vector<2x64xf32> to vector<2x16xf32>
    %35 = arith.negf %34 : vector<2x16xf32>
    %36 = math.exp %35 : vector<2x16xf32>
    %cst_34 = arith.constant 1.000000e+00 : f32
    %37 = vector.broadcast %cst_34 : f32 to vector<2x16xf32>
    %38 = arith.addf %37, %36 : vector<2x16xf32>
    %39 = arith.divf %37, %38 : vector<2x16xf32>
    %40 = vector.extract_strided_slice %33 {offsets = [0, 16], sizes = [2, 16], strides = [1, 1]} : vector<2x64xf32> to vector<2x16xf32>
    %41 = arith.negf %40 : vector<2x16xf32>
    %42 = math.exp %41 : vector<2x16xf32>
    %cst_35 = arith.constant 1.000000e+00 : f32
    %43 = vector.broadcast %cst_35 : f32 to vector<2x16xf32>
    %44 = arith.addf %43, %42 : vector<2x16xf32>
    %45 = arith.divf %43, %44 : vector<2x16xf32>
    %46 = vector.extract_strided_slice %33 {offsets = [0, 32], sizes = [2, 16], strides = [1, 1]} : vector<2x64xf32> to vector<2x16xf32>
    %47 = math.tanh %46 : vector<2x16xf32>
    %48 = vector.extract_strided_slice %33 {offsets = [0, 48], sizes = [2, 16], strides = [1, 1]} : vector<2x64xf32> to vector<2x16xf32>
    %49 = arith.negf %48 : vector<2x16xf32>
    %50 = math.exp %49 : vector<2x16xf32>
    %cst_36 = arith.constant 1.000000e+00 : f32
    %51 = vector.broadcast %cst_36 : f32 to vector<2x16xf32>
    %52 = arith.addf %51, %50 : vector<2x16xf32>
    %53 = arith.divf %51, %52 : vector<2x16xf32>
    %54 = arith.mulf %45, %24 : vector<2x16xf32>
    %55 = arith.mulf %39, %47 : vector<2x16xf32>
    %56 = arith.addf %54, %55 : vector<2x16xf32>
    %57 = math.tanh %56 : vector<2x16xf32>
    %58 = arith.mulf %53, %57 : vector<2x16xf32>
    %59 = arith.index_cast %c0_i32_31 : i32 to index
    %c0_37 = arith.constant 0 : index
    %c0_38 = arith.constant 0 : index
    %60 = vector.load %arg9[%59, %c0_37, %c0_38] : memref<3x2x16xf32, #tpu.memory_space<vmem>>, vector<1x2x16xf32>
    %61 = vector.shape_cast %60 : vector<1x2x16xf32> to vector<2x16xf32>
    %62 = vector.shape_cast %58 : vector<2x16xf32> to vector<1x2x16xf32>
    tpu.vector_store %arg9[%59, %c0_37, %c0_38], %62 {strides = array<i32>} : memref<3x2x16xf32, #tpu.memory_space<vmem>>, vector<1x2x16xf32>,
    %c2_i32_39 = arith.constant 2 : i32
    %63 = arith.subi %c2_i32_39, %c0_i32_31 : i32
    %c2_i32_40 = arith.constant 2 : i32
    %64 = arith.muli %63, %c2_i32_40 : i32
    %65 = tpu.assume_multiple %64, 2 : i32
    %66 = arith.index_cast %65 : i32 to index
    %c0_41 = arith.constant 0 : index
    %67 = vector.load %arg18[%66, %c0_41] : memref<6x64xf32, #tpu.memory_space<vmem>>, vector<2x64xf32>
    %68 = arith.truncf %25 : vector<2x16xf32> to vector<2x16xbf16>
    %cst_42 = arith.constant dense<0.000000e+00> : vector<2x64xf32>
    %69 = tpu.matmul %68, %22, %cst_42 {dimension_numbers = #tpu.dot_dimension_numbers<[1], [0], [0], [1], [0, 0, 1, 1], [], []>} : vector<2x16xbf16>, vector<16x64xbf16>, vector<2x64xf32> -> vector<2x64xf32>
    %70 = arith.addf %67, %69 : vector<2x64xf32>
    %71 = vector.extract_strided_slice %70 {offsets = [0, 0], sizes = [2, 16], strides = [1, 1]} : vector<2x64xf32> to vector<2x16xf32>
    %72 = arith.negf %71 : vector<2x16xf32>
    %73 = math.exp %72 : vector<2x16xf32>
    %cst_43 = arith.constant 1.000000e+00 : f32
    %74 = vector.broadcast %cst_43 : f32 to vector<2x16xf32>
    %75 = arith.addf %74, %73 : vector<2x16xf32>
    %76 = arith.divf %74, %75 : vector<2x16xf32>
    %77 = vector.extract_strided_slice %70 {offsets = [0, 16], sizes = [2, 16], strides = [1, 1]} : vector<2x64xf32> to vector<2x16xf32>
    %78 = arith.negf %77 : vector<2x16xf32>
    %79 = math.exp %78 : vector<2x16xf32>
    %cst_44 = arith.constant 1.000000e+00 : f32
    %80 = vector.broadcast %cst_44 : f32 to vector<2x16xf32>
    %81 = arith.addf %80, %79 : vector<2x16xf32>
    %82 = arith.divf %80, %81 : vector<2x16xf32>
    %83 = vector.extract_strided_slice %70 {offsets = [0, 32], sizes = [2, 16], strides = [1, 1]} : vector<2x64xf32> to vector<2x16xf32>
    %84 = math.tanh %83 : vector<2x16xf32>
    %85 = vector.extract_strided_slice %70 {offsets = [0, 48], sizes = [2, 16], strides = [1, 1]} : vector<2x64xf32> to vector<2x16xf32>
    %86 = arith.negf %85 : vector<2x16xf32>
    %87 = math.exp %86 : vector<2x16xf32>
    %cst_45 = arith.constant 1.000000e+00 : f32
    %88 = vector.broadcast %cst_45 : f32 to vector<2x16xf32>
    %89 = arith.addf %88, %87 : vector<2x16xf32>
    %90 = arith.divf %88, %89 : vector<2x16xf32>
    %91 = arith.mulf %82, %26 : vector<2x16xf32>
    %92 = arith.mulf %76, %84 : vector<2x16xf32>
    %93 = arith.addf %91, %92 : vector<2x16xf32>
    %94 = math.tanh %93 : vector<2x16xf32>
    %95 = arith.mulf %90, %94 : vector<2x16xf32>
    %96 = arith.index_cast %63 : i32 to index
    %c0_46 = arith.constant 0 : index
    %c0_47 = arith.constant 0 : index
    %97 = vector.load %arg10[%96, %c0_46, %c0_47] : memref<3x2x16xf32, #tpu.memory_space<vmem>>, vector<1x2x16xf32>
    %98 = vector.shape_cast %97 : vector<1x2x16xf32> to vector<2x16xf32>
    %99 = vector.shape_cast %95 : vector<2x16xf32> to vector<1x2x16xf32>
    tpu.vector_store %arg10[%96, %c0_46, %c0_47], %99 {strides = array<i32>} : memref<3x2x16xf32, #tpu.memory_space<vmem>>, vector<1x2x16xf32>,
    %c1_i32 = arith.constant 1 : i32
    %c2_i32_48 = arith.constant 2 : i32
    %100 = arith.muli %c1_i32, %c2_i32_48 : i32
    %101 = tpu.assume_multiple %100, 2 : i32
    %102 = arith.index_cast %101 : i32 to index
    %c0_49 = arith.constant 0 : index
    %103 = vector.load %arg17[%102, %c0_49] : memref<6x64xf32, #tpu.memory_space<vmem>>, vector<2x64xf32>
    %104 = arith.truncf %58 : vector<2x16xf32> to vector<2x16xbf16>
    %cst_50 = arith.constant dense<0.000000e+00> : vector<2x64xf32>
    %105 = tpu.matmul %104, %21, %cst_50 {dimension_numbers = #tpu.dot_dimension_numbers<[1], [0], [0], [1], [0, 0, 1, 1], [], []>} : vector<2x16xbf16>, vector<16x64xbf16>, vector<2x64xf32> -> vector<2x64xf32>
    %106 = arith.addf %103, %105 : vector<2x64xf32>
    %107 = vector.extract_strided_slice %106 {offsets = [0, 0], sizes = [2, 16], strides = [1, 1]} : vector<2x64xf32> to vector<2x16xf32>
    %108 = arith.negf %107 : vector<2x16xf32>
    %109 = math.exp %108 : vector<2x16xf32>
    %cst_51 = arith.constant 1.000000e+00 : f32
    %110 = vector.broadcast %cst_51 : f32 to vector<2x16xf32>
    %111 = arith.addf %110, %109 : vector<2x16xf32>
    %112 = arith.divf %110, %111 : vector<2x16xf32>
    %113 = vector.extract_strided_slice %106 {offsets = [0, 16], sizes = [2, 16], strides = [1, 1]} : vector<2x64xf32> to vector<2x16xf32>
    %114 = arith.negf %113 : vector<2x16xf32>
    %115 = math.exp %114 : vector<2x16xf32>
    %cst_52 = arith.constant 1.000000e+00 : f32
    %116 = vector.broadcast %cst_52 : f32 to vector<2x16xf32>
    %117 = arith.addf %116, %115 : vector<2x16xf32>
    %118 = arith.divf %116, %117 : vector<2x16xf32>
    %119 = vector.extract_strided_slice %106 {offsets = [0, 32], sizes = [2, 16], strides = [1, 1]} : vector<2x64xf32> to vector<2x16xf32>
    %120 = math.tanh %119 : vector<2x16xf32>
    %121 = vector.extract_strided_slice %106 {offsets = [0, 48], sizes = [2, 16], strides = [1, 1]} : vector<2x64xf32> to vector<2x16xf32>
    %122 = arith.negf %121 : vector<2x16xf32>
    %123 = math.exp %122 : vector<2x16xf32>
    %cst_53 = arith.constant 1.000000e+00 : f32
    %124 = vector.broadcast %cst_53 : f32 to vector<2x16xf32>
    %125 = arith.addf %124, %123 : vector<2x16xf32>
    %126 = arith.divf %124, %125 : vector<2x16xf32>
    %127 = arith.mulf %118, %56 : vector<2x16xf32>
    %128 = arith.mulf %112, %120 : vector<2x16xf32>
    %129 = arith.addf %127, %128 : vector<2x16xf32>
    %130 = math.tanh %129 : vector<2x16xf32>
    %131 = arith.mulf %126, %130 : vector<2x16xf32>
    %132 = arith.index_cast %c1_i32 : i32 to index
    %c0_54 = arith.constant 0 : index
    %c0_55 = arith.constant 0 : index
    %133 = vector.load %arg9[%132, %c0_54, %c0_55] : memref<3x2x16xf32, #tpu.memory_space<vmem>>, vector<1x2x16xf32>
    %134 = vector.shape_cast %133 : vector<1x2x16xf32> to vector<2x16xf32>
    %135 = vector.shape_cast %131 : vector<2x16xf32> to vector<1x2x16xf32>
    tpu.vector_store %arg9[%132, %c0_54, %c0_55], %135 {strides = array<i32>} : memref<3x2x16xf32, #tpu.memory_space<vmem>>, vector<1x2x16xf32>,
    %c2_i32_56 = arith.constant 2 : i32
    %136 = arith.subi %c2_i32_56, %c1_i32 : i32
    %c2_i32_57 = arith.constant 2 : i32
    %137 = arith.muli %136, %c2_i32_57 : i32
    %138 = tpu.assume_multiple %137, 2 : i32
    %139 = arith.index_cast %138 : i32 to index
    %c0_58 = arith.constant 0 : index
    %140 = vector.load %arg18[%139, %c0_58] : memref<6x64xf32, #tpu.memory_space<vmem>>, vector<2x64xf32>
    %141 = arith.truncf %95 : vector<2x16xf32> to vector<2x16xbf16>
    %cst_59 = arith.constant dense<0.000000e+00> : vector<2x64xf32>
    %142 = tpu.matmul %141, %22, %cst_59 {dimension_numbers = #tpu.dot_dimension_numbers<[1], [0], [0], [1], [0, 0, 1, 1], [], []>} : vector<2x16xbf16>, vector<16x64xbf16>, vector<2x64xf32> -> vector<2x64xf32>
    %143 = arith.addf %140, %142 : vector<2x64xf32>
    %144 = vector.extract_strided_slice %143 {offsets = [0, 0], sizes = [2, 16], strides = [1, 1]} : vector<2x64xf32> to vector<2x16xf32>
    %145 = arith.negf %144 : vector<2x16xf32>
    %146 = math.exp %145 : vector<2x16xf32>
    %cst_60 = arith.constant 1.000000e+00 : f32
    %147 = vector.broadcast %cst_60 : f32 to vector<2x16xf32>
    %148 = arith.addf %147, %146 : vector<2x16xf32>
    %149 = arith.divf %147, %148 : vector<2x16xf32>
    %150 = vector.extract_strided_slice %143 {offsets = [0, 16], sizes = [2, 16], strides = [1, 1]} : vector<2x64xf32> to vector<2x16xf32>
    %151 = arith.negf %150 : vector<2x16xf32>
    %152 = math.exp %151 : vector<2x16xf32>
    %cst_61 = arith.constant 1.000000e+00 : f32
    %153 = vector.broadcast %cst_61 : f32 to vector<2x16xf32>
    %154 = arith.addf %153, %152 : vector<2x16xf32>
    %155 = arith.divf %153, %154 : vector<2x16xf32>
    %156 = vector.extract_strided_slice %143 {offsets = [0, 32], sizes = [2, 16], strides = [1, 1]} : vector<2x64xf32> to vector<2x16xf32>
    %157 = math.tanh %156 : vector<2x16xf32>
    %158 = vector.extract_strided_slice %143 {offsets = [0, 48], sizes = [2, 16], strides = [1, 1]} : vector<2x64xf32> to vector<2x16xf32>
    %159 = arith.negf %158 : vector<2x16xf32>
    %160 = math.exp %159 : vector<2x16xf32>
    %cst_62 = arith.constant 1.000000e+00 : f32
    %161 = vector.broadcast %cst_62 : f32 to vector<2x16xf32>
    %162 = arith.addf %161, %160 : vector<2x16xf32>
    %163 = arith.divf %161, %162 : vector<2x16xf32>
    %164 = arith.mulf %155, %93 : vector<2x16xf32>
    %165 = arith.mulf %149, %157 : vector<2x16xf32>
    %166 = arith.addf %164, %165 : vector<2x16xf32>
    %167 = math.tanh %166 : vector<2x16xf32>
    %168 = arith.mulf %163, %167 : vector<2x16xf32>
    %169 = arith.index_cast %136 : i32 to index
    %c0_63 = arith.constant 0 : index
    %c0_64 = arith.constant 0 : index
    %170 = vector.load %arg10[%169, %c0_63, %c0_64] : memref<3x2x16xf32, #tpu.memory_space<vmem>>, vector<1x2x16xf32>
    %171 = vector.shape_cast %170 : vector<1x2x16xf32> to vector<2x16xf32>
    %172 = vector.shape_cast %168 : vector<2x16xf32> to vector<1x2x16xf32>
    tpu.vector_store %arg10[%169, %c0_63, %c0_64], %172 {strides = array<i32>} : memref<3x2x16xf32, #tpu.memory_space<vmem>>, vector<1x2x16xf32>,
    %c2_i32_65 = arith.constant 2 : i32
    %c2_i32_66 = arith.constant 2 : i32
    %173 = arith.muli %c2_i32_65, %c2_i32_66 : i32
    %174 = tpu.assume_multiple %173, 2 : i32
    %175 = arith.index_cast %174 : i32 to index
    %c0_67 = arith.constant 0 : index
    %176 = vector.load %arg17[%175, %c0_67] : memref<6x64xf32, #tpu.memory_space<vmem>>, vector<2x64xf32>
    %177 = arith.truncf %131 : vector<2x16xf32> to vector<2x16xbf16>
    %cst_68 = arith.constant dense<0.000000e+00> : vector<2x64xf32>
    %178 = tpu.matmul %177, %21, %cst_68 {dimension_numbers = #tpu.dot_dimension_numbers<[1], [0], [0], [1], [0, 0, 1, 1], [], []>} : vector<2x16xbf16>, vector<16x64xbf16>, vector<2x64xf32> -> vector<2x64xf32>
    %179 = arith.addf %176, %178 : vector<2x64xf32>
    %180 = vector.extract_strided_slice %179 {offsets = [0, 0], sizes = [2, 16], strides = [1, 1]} : vector<2x64xf32> to vector<2x16xf32>
    %181 = arith.negf %180 : vector<2x16xf32>
    %182 = math.exp %181 : vector<2x16xf32>
    %cst_69 = arith.constant 1.000000e+00 : f32
    %183 = vector.broadcast %cst_69 : f32 to vector<2x16xf32>
    %184 = arith.addf %183, %182 : vector<2x16xf32>
    %185 = arith.divf %183, %184 : vector<2x16xf32>
    %186 = vector.extract_strided_slice %179 {offsets = [0, 16], sizes = [2, 16], strides = [1, 1]} : vector<2x64xf32> to vector<2x16xf32>
    %187 = arith.negf %186 : vector<2x16xf32>
    %188 = math.exp %187 : vector<2x16xf32>
    %cst_70 = arith.constant 1.000000e+00 : f32
    %189 = vector.broadcast %cst_70 : f32 to vector<2x16xf32>
    %190 = arith.addf %189, %188 : vector<2x16xf32>
    %191 = arith.divf %189, %190 : vector<2x16xf32>
    %192 = vector.extract_strided_slice %179 {offsets = [0, 32], sizes = [2, 16], strides = [1, 1]} : vector<2x64xf32> to vector<2x16xf32>
    %193 = math.tanh %192 : vector<2x16xf32>
    %194 = vector.extract_strided_slice %179 {offsets = [0, 48], sizes = [2, 16], strides = [1, 1]} : vector<2x64xf32> to vector<2x16xf32>
    %195 = arith.negf %194 : vector<2x16xf32>
    %196 = math.exp %195 : vector<2x16xf32>
    %cst_71 = arith.constant 1.000000e+00 : f32
    %197 = vector.broadcast %cst_71 : f32 to vector<2x16xf32>
    %198 = arith.addf %197, %196 : vector<2x16xf32>
    %199 = arith.divf %197, %198 : vector<2x16xf32>
    %200 = arith.mulf %191, %129 : vector<2x16xf32>
    %201 = arith.mulf %185, %193 : vector<2x16xf32>
    %202 = arith.addf %200, %201 : vector<2x16xf32>
    %203 = math.tanh %202 : vector<2x16xf32>
    %204 = arith.mulf %199, %203 : vector<2x16xf32>
    %205 = arith.index_cast %c2_i32_65 : i32 to index
    %c0_72 = arith.constant 0 : index
    %c0_73 = arith.constant 0 : index
    %206 = vector.load %arg9[%205, %c0_72, %c0_73] : memref<3x2x16xf32, #tpu.memory_space<vmem>>, vector<1x2x16xf32>
    %207 = vector.shape_cast %206 : vector<1x2x16xf32> to vector<2x16xf32>
    %208 = vector.shape_cast %204 : vector<2x16xf32> to vector<1x2x16xf32>
    tpu.vector_store %arg9[%205, %c0_72, %c0_73], %208 {strides = array<i32>} : memref<3x2x16xf32, #tpu.memory_space<vmem>>, vector<1x2x16xf32>,
    %c2_i32_74 = arith.constant 2 : i32
    %209 = arith.subi %c2_i32_74, %c2_i32_65 : i32
    %c2_i32_75 = arith.constant 2 : i32
    %210 = arith.muli %209, %c2_i32_75 : i32
    %211 = tpu.assume_multiple %210, 2 : i32
    %212 = arith.index_cast %211 : i32 to index
    %c0_76 = arith.constant 0 : index
    %213 = vector.load %arg18[%212, %c0_76] : memref<6x64xf32, #tpu.memory_space<vmem>>, vector<2x64xf32>
    %214 = arith.truncf %168 : vector<2x16xf32> to vector<2x16xbf16>
    %cst_77 = arith.constant dense<0.000000e+00> : vector<2x64xf32>
    %215 = tpu.matmul %214, %22, %cst_77 {dimension_numbers = #tpu.dot_dimension_numbers<[1], [0], [0], [1], [0, 0, 1, 1], [], []>} : vector<2x16xbf16>, vector<16x64xbf16>, vector<2x64xf32> -> vector<2x64xf32>
    %216 = arith.addf %213, %215 : vector<2x64xf32>
    %217 = vector.extract_strided_slice %216 {offsets = [0, 0], sizes = [2, 16], strides = [1, 1]} : vector<2x64xf32> to vector<2x16xf32>
    %218 = arith.negf %217 : vector<2x16xf32>
    %219 = math.exp %218 : vector<2x16xf32>
    %cst_78 = arith.constant 1.000000e+00 : f32
    %220 = vector.broadcast %cst_78 : f32 to vector<2x16xf32>
    %221 = arith.addf %220, %219 : vector<2x16xf32>
    %222 = arith.divf %220, %221 : vector<2x16xf32>
    %223 = vector.extract_strided_slice %216 {offsets = [0, 16], sizes = [2, 16], strides = [1, 1]} : vector<2x64xf32> to vector<2x16xf32>
    %224 = arith.negf %223 : vector<2x16xf32>
    %225 = math.exp %224 : vector<2x16xf32>
    %cst_79 = arith.constant 1.000000e+00 : f32
    %226 = vector.broadcast %cst_79 : f32 to vector<2x16xf32>
    %227 = arith.addf %226, %225 : vector<2x16xf32>
    %228 = arith.divf %226, %227 : vector<2x16xf32>
    %229 = vector.extract_strided_slice %216 {offsets = [0, 32], sizes = [2, 16], strides = [1, 1]} : vector<2x64xf32> to vector<2x16xf32>
    %230 = math.tanh %229 : vector<2x16xf32>
    %231 = vector.extract_strided_slice %216 {offsets = [0, 48], sizes = [2, 16], strides = [1, 1]} : vector<2x64xf32> to vector<2x16xf32>
    %232 = arith.negf %231 : vector<2x16xf32>
    %233 = math.exp %232 : vector<2x16xf32>
    %cst_80 = arith.constant 1.000000e+00 : f32
    %234 = vector.broadcast %cst_80 : f32 to vector<2x16xf32>
    %235 = arith.addf %234, %233 : vector<2x16xf32>
    %236 = arith.divf %234, %235 : vector<2x16xf32>
    %237 = arith.mulf %228, %166 : vector<2x16xf32>
    %238 = arith.mulf %222, %230 : vector<2x16xf32>
    %239 = arith.addf %237, %238 : vector<2x16xf32>
    %240 = math.tanh %239 : vector<2x16xf32>
    %241 = arith.mulf %236, %240 : vector<2x16xf32>
    %242 = arith.index_cast %209 : i32 to index
    %c0_81 = arith.constant 0 : index
    %c0_82 = arith.constant 0 : index
    %243 = vector.load %arg10[%242, %c0_81, %c0_82] : memref<3x2x16xf32, #tpu.memory_space<vmem>>, vector<1x2x16xf32>
    %244 = vector.shape_cast %243 : vector<1x2x16xf32> to vector<2x16xf32>
    %245 = vector.shape_cast %241 : vector<2x16xf32> to vector<1x2x16xf32>
    tpu.vector_store %arg10[%242, %c0_81, %c0_82], %245 {strides = array<i32>} : memref<3x2x16xf32, #tpu.memory_space<vmem>>, vector<1x2x16xf32>,
    %c3_i32 = arith.constant 3 : i32
    %c0_83 = arith.constant 0 : index
    %c0_84 = arith.constant 0 : index
    %246 = vector.load %arg13[%c0_83, %c0_84] : memref<2x16xf32, #tpu.memory_space<vmem>>, vector<2x16xf32>
    tpu.vector_store %arg13[%c0_83, %c0_84], %204 {strides = array<i32>} : memref<2x16xf32, #tpu.memory_space<vmem>>, vector<2x16xf32>,
    %c0_85 = arith.constant 0 : index
    %c0_86 = arith.constant 0 : index
    %247 = vector.load %arg14[%c0_85, %c0_86] : memref<2x16xf32, #tpu.memory_space<vmem>>, vector<2x16xf32>
    tpu.vector_store %arg14[%c0_85, %c0_86], %202 {strides = array<i32>} : memref<2x16xf32, #tpu.memory_space<vmem>>, vector<2x16xf32>,
    %c0_87 = arith.constant 0 : index
    %c0_88 = arith.constant 0 : index
    %248 = vector.load %arg15[%c0_87, %c0_88] : memref<2x16xf32, #tpu.memory_space<vmem>>, vector<2x16xf32>
    tpu.vector_store %arg15[%c0_87, %c0_88], %241 {strides = array<i32>} : memref<2x16xf32, #tpu.memory_space<vmem>>, vector<2x16xf32>,
    %c0_89 = arith.constant 0 : index
    %c0_90 = arith.constant 0 : index
    %249 = vector.load %arg16[%c0_89, %c0_90] : memref<2x16xf32, #tpu.memory_space<vmem>>, vector<2x16xf32>
    tpu.vector_store %arg16[%c0_89, %c0_90], %239 {strides = array<i32>} : memref<2x16xf32, #tpu.memory_space<vmem>>, vector<2x16xf32>,
    %c0_91 = arith.constant 0 : index
    %c0_92 = arith.constant 0 : index
    %c0_93 = arith.constant 0 : index
    %250 = vector.load %arg11[%c0_91, %c0_92, %c0_93] : memref<2x2x16xf32, #tpu.memory_space<vmem>>, vector<1x2x16xf32>
    %251 = vector.shape_cast %250 : vector<1x2x16xf32> to vector<2x16xf32>
    %252 = vector.shape_cast %204 : vector<2x16xf32> to vector<1x2x16xf32>
    tpu.vector_store %arg11[%c0_91, %c0_92, %c0_93], %252 {strides = array<i32>} : memref<2x2x16xf32, #tpu.memory_space<vmem>>, vector<1x2x16xf32>,
    %c1 = arith.constant 1 : index
    %c0_94 = arith.constant 0 : index
    %c0_95 = arith.constant 0 : index
    %253 = vector.load %arg11[%c1, %c0_94, %c0_95] : memref<2x2x16xf32, #tpu.memory_space<vmem>>, vector<1x2x16xf32>
    %254 = vector.shape_cast %253 : vector<1x2x16xf32> to vector<2x16xf32>
    %255 = vector.shape_cast %241 : vector<2x16xf32> to vector<1x2x16xf32>
    tpu.vector_store %arg11[%c1, %c0_94, %c0_95], %255 {strides = array<i32>} : memref<2x2x16xf32, #tpu.memory_space<vmem>>, vector<1x2x16xf32>,
    %c0_96 = arith.constant 0 : index
    %c0_97 = arith.constant 0 : index
    %c0_98 = arith.constant 0 : index
    %256 = vector.load %arg12[%c0_96, %c0_97, %c0_98] : memref<2x2x16xf32, #tpu.memory_space<vmem>>, vector<1x2x16xf32>
    %257 = vector.shape_cast %256 : vector<1x2x16xf32> to vector<2x16xf32>
    %258 = vector.shape_cast %202 : vector<2x16xf32> to vector<1x2x16xf32>
    tpu.vector_store %arg12[%c0_96, %c0_97, %c0_98], %258 {strides = array<i32>} : memref<2x2x16xf32, #tpu.memory_space<vmem>>, vector<1x2x16xf32>,
    %c1_99 = arith.constant 1 : index
    %c0_100 = arith.constant 0 : index
    %c0_101 = arith.constant 0 : index
    %259 = vector.load %arg12[%c1_99, %c0_100, %c0_101] : memref<2x2x16xf32, #tpu.memory_space<vmem>>, vector<1x2x16xf32>
    %260 = vector.shape_cast %259 : vector<1x2x16xf32> to vector<2x16xf32>
    %261 = vector.shape_cast %239 : vector<2x16xf32> to vector<1x2x16xf32>
    tpu.vector_store %arg12[%c1_99, %c0_100, %c0_101], %261 {strides = array<i32>} : memref<2x2x16xf32, #tpu.memory_space<vmem>>, vector<1x2x16xf32>,
    return
  }
  func.func @transform_0(%arg0: i32) -> (i32, i32, i32) {
    %c0_i32 = arith.constant 0 : i32
    %c0_i32_0 = arith.constant 0 : i32
    %c0_i32_1 = arith.constant 0 : i32
    return %arg0, %c0_i32, %c0_i32_0 : i32, i32, i32
  }
  func.func @transform_1(%arg0: i32) -> (i32, i32, i32) {
    %c1_i32 = arith.constant 1 : i32
    %0 = arith.subi %c1_i32, %arg0 : i32
    %c0_i32 = arith.constant 0 : i32
    %c0_i32_0 = arith.constant 0 : i32
    %c0_i32_1 = arith.constant 0 : i32
    return %0, %c0_i32, %c0_i32_0 : i32, i32, i32
  }
  func.func @transform_2(%arg0: i32) -> (i32, i32) {
    %c0_i32 = arith.constant 0 : i32
    %c0_i32_0 = arith.constant 0 : i32
    %c0_i32_1 = arith.constant 0 : i32
    return %c0_i32, %c0_i32_0 : i32, i32
  }
  func.func @transform_3(%arg0: i32) -> (i32, i32) {
    %c0_i32 = arith.constant 0 : i32
    %c0_i32_0 = arith.constant 0 : i32
    %c0_i32_1 = arith.constant 0 : i32
    return %c0_i32, %c0_i32_0 : i32, i32
  }
  func.func @transform_4(%arg0: i32) -> (i32, i32) {
    %c0_i32 = arith.constant 0 : i32
    %c0_i32_0 = arith.constant 0 : i32
    %c0_i32_1 = arith.constant 0 : i32
    return %c0_i32, %c0_i32_0 : i32, i32
  }
  func.func @transform_5(%arg0: i32) -> (i32, i32) {
    %c0_i32 = arith.constant 0 : i32
    %c0_i32_0 = arith.constant 0 : i32
    %c0_i32_1 = arith.constant 0 : i32
    return %c0_i32, %c0_i32_0 : i32, i32
  }
  func.func @transform_6(%arg0: i32) -> (i32, i32) {
    %c0_i32 = arith.constant 0 : i32
    %c0_i32_0 = arith.constant 0 : i32
    %c0_i32_1 = arith.constant 0 : i32
    return %c0_i32, %c0_i32_0 : i32, i32
  }
  func.func @transform_7(%arg0: i32) -> (i32, i32) {
    %c0_i32 = arith.constant 0 : i32
    %c0_i32_0 = arith.constant 0 : i32
    %c0_i32_1 = arith.constant 0 : i32
    return %c0_i32, %c0_i32_0 : i32, i32
  }
  func.func @transform_8(%arg0: i32) -> (i32, i32, i32) {
    %c0_i32 = arith.constant 0 : i32
    %c0_i32_0 = arith.constant 0 : i32
    %c0_i32_1 = arith.constant 0 : i32
    return %arg0, %c0_i32, %c0_i32_0 : i32, i32, i32
  }
  func.func @transform_9(%arg0: i32) -> (i32, i32, i32) {
    %c1_i32 = arith.constant 1 : i32
    %0 = arith.subi %c1_i32, %arg0 : i32
    %c0_i32 = arith.constant 0 : i32
    %c0_i32_0 = arith.constant 0 : i32
    %c0_i32_1 = arith.constant 0 : i32
    return %0, %c0_i32, %c0_i32_0 : i32, i32, i32
  }
  func.func @transform_10(%arg0: i32) -> (i32, i32, i32) {
    %c0_i32 = arith.constant 0 : i32
    %c0_i32_0 = arith.constant 0 : i32
    %c0_i32_1 = arith.constant 0 : i32
    %c0_i32_2 = arith.constant 0 : i32
    return %c0_i32, %c0_i32_0, %c0_i32_1 : i32, i32, i32
  }
  func.func @transform_11(%arg0: i32) -> (i32, i32, i32) {
    %c0_i32 = arith.constant 0 : i32
    %c0_i32_0 = arith.constant 0 : i32
    %c0_i32_1 = arith.constant 0 : i32
    %c0_i32_2 = arith.constant 0 : i32
    return %c0_i32, %c0_i32_0, %c0_i32_1 : i32, i32, i32
  }
}

</mosaic_0001>

<bundles_post_ra>
// kernel: tpu_custom_call.1
= control target key start
LH: loop header
LB: loop body
LE: loop exit
PB: predicated region body
PF: predicated region fallthrough
CT: control target
= control target key end

     0   :  { %s2480_s0 = inlined_call_operand.hbm [shape: f32[6,2,16], index: 0, kind: input, shape index: {}]   ;;  %s2481_s1 = inlined_call_operand.hbm [shape: f32[6,2,16], index: 1, kind: input, shape index: {}]   ;;  %s2482_s2 = inlined_call_operand.hbm [shape: bf16[16,64], index: 2, kind: input, shape index: {}]   ;;  %s2483_s3 = inlined_call_operand.hbm [shape: bf16[16,64], index: 3, kind: input, shape index: {}]   ;;  %s2484_s4 = inlined_call_operand.vmem [shape: f32[1,64], index: 4, kind: input, shape index: {}]   ;;  %s2485_s5 = inlined_call_operand.hbm [shape: bf16[16,64], index: 5, kind: input, shape index: {}]   ;;  %s2486_s6 = inlined_call_operand.hbm [shape: bf16[16,64], index: 6, kind: input, shape index: {}]   ;;  %s2487_s7 = inlined_call_operand.vmem [shape: f32[1,64], index: 7, kind: input, shape index: {}]   ;;  %s2488_s8 = inlined_call_operand.hbm [shape: f32[6,2,16], index: 8, kind: output, shape index: {0}]   ;;  %s2489_s9 = inlined_call_operand.hbm [shape: f32[6,2,16], index: 9, kind: output, shape index: {1}]   ;;  %s2490_s10 = inlined_call_operand.hbm [shape: f32[2,2,16], index: 10, kind: output, shape index: {2}]   ;;  %s2491_s11 = inlined_call_operand.hbm [shape: f32[2,2,16], index: 11, kind: output, shape index: {3}]  }
   0x1   :  { %2507 = sst [smem:[#allocation39_spill]] %s2480_s0 }
   0x2   :  { %2508 = sst [smem:[#allocation40_spill]] %s2481_s1 }
   0x3   :  { %2509 = sst [smem:[#allocation41_spill]] %s2482_s2 }
   0x4   :  { %2510 = sst [smem:[#allocation42_spill]] %s2483_s3 }
   0x5   :  { %2511 = sst [smem:[#allocation43_spill]] %s2484_s4 }
   0x6   :  { %2512 = sst [smem:[#allocation44_spill]] %s2485_s5 }
   0x7   :  { %2513 = sst [smem:[#allocation45_spill]] %s2486_s6 }
   0x8   :  { %2514 = sst [smem:[#allocation46_spill]] %s2488_s8 }
   0x9   :  { %2515 = sst [smem:[#allocation47_spill]] %s2489_s9 }
   0xa   :  { %2516 = sst [smem:[#allocation48_spill]] %s2490_s10 }
   0xb   :  { %17 = vsyncpa [#allocation9], 0 }
   0xc   :  { %19 = vsyncpa [#allocation9 + $0x1], 0 }
   0xd   :  { %20 = vsyncpa [#allocation12], 0 }
   0xe   :  { %22 = vsyncpa [#allocation12 + $0x1], 0 }
   0xf   :  { %23 = vsyncpa [#allocation15], 0 }
  0x10   :  { %24 = vsyncpa [#allocation18], 0 }
  0x11   :  { %25 = vsyncpa [#allocation10], 0 }
  0x12   :  { %27 = vsyncpa [#allocation10 + $0x1], 0 }
  0x13   :  { %28 = vsyncpa [#allocation21], 0 }
  0x14   :  { %30 = vsyncpa [#allocation21 + $0x1], 0 }
  0x15   :  { %31 = vsyncpa [#allocation24], 0  ;;  %s2046_s17 = smov 0   ;;  %s2048_s18 = smov 0  }
  0x16   :  { %s2050_s19 = smov 0   ;;  %s2052_s20 = smov 0  }
  0x17   :  { %s2054_s21 = smov 0   ;;  %s2056_s22 = smov 0  }
  0x18   :  { %s2058_s23 = smov 0  }
  0x19 LB: > { %2517 = sst [smem:[#allocation34_spill]] %s1963_s22  ;;  %s2082_s24 = sadd.s32 4294967295, %s1967_s23   ;;  %s1967_s23 = sphi %s2058_s23, %s2578_s23   ;;  %s1963_s22 = sphi %s2056_s22, %s2572_s22   ;;  %s1959_s21 = sphi %s2054_s21, %s2577_s21   ;;  %s1955_s20 = sphi %s2052_s20, %s2576_s20   ;;  %s1951_s19 = sphi %s2050_s19, %s2575_s19   ;;  %s1947_s18 = sphi %s2048_s18, %s2574_s18   ;;  %s1943_s17 = sphi %s2046_s17, %s2573_s17  }
  0x1a   : > { %p85_p0 = scmp.ne.s32.totalorder %s1947_s18, %s1943_s17  ;;  %p2498_p1 = scmp.eq.s32.totalorder %s2082_s24, 0 }
  0x1b   : > { %p2494_p2 = scmp.eq.s32.totalorder %s2082_s24, 1  ;;  %p1321_p3 = scmp.ge.s32.totalorder %s1967_s23, 1 }
  0x1c   : > { %p318_p4 = scmp.lt.s32.totalorder %s1967_s23, 3  ;;  %p2095_p5 = por %p85_p0, %p2498_p1 }
  0x1d   : > { %s2520_s2 = sld [smem:[#allocation41_spill]]  ;;  %s1969_s30 = smov [#allocation13]  }
  0x1e   : > { %p2100_p7 = pnand %p1321_p3, %p318_p4  ;;  %s331_s12 = sshll.u32 %s1969_s30, 4  ;;  %s332_s12 = int_to_ptr.vmem [resolvable:$true] %s331_s12 }
  0x1f   : > { %s2522_s3 = sld [smem:[#allocation42_spill]]  ;;  %s1970_s27 = smov 64  }
  0x20   : > { %p1421_p8 = pneg %p2100_p7  ;;  %s1971_s28 = smov 4  }
  0x21   : > { %s2523_s5 = sld [smem:[#allocation44_spill]]  ;;  %s1972_s8 = smov [#allocation14]  }
  0x22   : > { %p2111_p9 = pnand %p1421_p8, %p2498_p1  ;;  %s345_s9 = sshll.u32 %s1972_s8, 4  ;;  %s346_s9 = int_to_ptr.vmem [resolvable:$true] %s345_s9 }
  0x23   : > { %s329_s29 = sshll.u32 %s2520_s2, 4  ;;  %s2524_s6 = sld [smem:[#allocation45_spill]]  ;;  %s330_s29 = int_to_ptr.hbm [resolvable:$true] %s329_s29 }
  0x24   : > { %1424 = dma.hbm_to_vmem [thread:$0]  (!%p2111_p9), %s330_s29, 128, %s332_s12, [#allocation12], %s1970_s27, %s1970_s27, %s1971_s28  }
  0x25   : > { %s343_s16 = sshll.u32 %s2522_s3, 4  ;;  %s1973_s29 = smov [#allocation16]   ;;  %s344_s16 = int_to_ptr.hbm [resolvable:$true] %s343_s16 }
  0x26   : > { %1427 = dma.hbm_to_vmem [thread:$0]  (!%p2111_p9), %s344_s16, 128, %s346_s9, [#allocation15], %s1970_s27, %s1970_s27, %s1971_s28  }
  0x27   : > { %s360_s10 = sshll.u32 %s2523_s5, 4  ;;  %s362_s12 = sshll.u32 %s1973_s29, 4  ;;  %s361_s10 = int_to_ptr.hbm [resolvable:$true] %s360_s10  ;;  %s363_s12 = int_to_ptr.vmem [resolvable:$true] %s362_s12 }
  0x28   : > { %1430 = dma.hbm_to_vmem [thread:$0]  (!%p2111_p9), %s361_s10, 128, %s363_s12, [#allocation15], %s1970_s27, %s1970_s27, %s1971_s28  }
  0x29   : > { %s374_s15 = sshll.u32 %s2524_s6, 4  ;;  %s1974_s8 = smov [#allocation17]   ;;  %s375_s15 = int_to_ptr.hbm [resolvable:$true] %s374_s15 }
  0x2a   : > { %s376_s9 = sshll.u32 %s1974_s8, 4  ;;  %s2495_s16 = sadd.s32 4294967294, %s1967_s23   ;;  %s377_s9 = int_to_ptr.vmem [resolvable:$true] %s376_s9 }
  0x2b   : > { %1433 = dma.hbm_to_vmem [thread:$0]  (!%p2111_p9), %s375_s15, 128, %s377_s9, [#allocation18], %s1970_s27, %s1970_s27, %s1971_s28  }
  0x2c   : > { %p51_p11 = scmp.ne.s32.totalorder %s1963_s22, %s1959_s21  ;;  %p2500_p12 = scmp.eq.s32.totalorder %s1967_s23, 0 }
  0x2d   : > { %p57_p13 = scmp.ne.s32.totalorder %s1959_s21, %s1955_s20  ;;  %p241_p4 = scmp.eq.s32.totalorder %s2495_s16, 1 }
  0x2e   : > { %p2142_p3 = por %p2494_p2, %p51_p11  ;;  %p53_p8 = por %p2500_p12, %p51_p11 }
  0x2f   : > { %p2152_p10 = por %p2498_p1, %p57_p13  ;;  %p2156_p9 = por %p241_p4, %p57_p13 }
  0x30   : > { %p2163_p6 = por %p241_p4, %p85_p0  ;;  %p2499_p2 = scmp.lt.s32.totalorder %s1967_s23, 2 }
  0x31   : > { %s2527_s13 = scalar_select %p2156_p9, 1, 0 }
  0x32   : > { %s2529_s27 = scalar_select %p2163_p6, 1, 0 }
  0x33   : > { %2528 = sst [smem:[#allocation35_spill]] %s2527_s13  ;;  %s393_s28 = sand.u32 1, %s1963_s22  }
  0x34   : > { %2530 = sst [smem:[#allocation36_spill]] %s2529_s27  ;;  %s1385_s12 = smul.u32 6, %s393_s28 }
  0x35   : > { %s1377_s2 = smul.u32 6, %s1967_s23  ;;  %p2172_p11 = pnand %p2499_p2, %p53_p8 }
  0x36   : > { %s2532_s0 = sld [smem:[#allocation39_spill]]  ;;  %s397_s16 = scalar_lea.vmem [#allocation8], %s1385_s12 }
  0x37   : > { %s405_s17 = sshll.u32 %s397_s16, 4  ;;  %s394_s3 = scalar_lea.sflag [#allocation9], %s393_s28  ;;  %s406_s17 = int_to_ptr.vmem [resolvable:$true] %s405_s17 }
  0x38   : > { %p1709_p13 = pneg %p2172_p11 }
  0x3c   : > { %s402_s9 = scalar_lea.hbm %s2532_s0, %s1377_s2  ;;  %s1712_s15 = scalar_lea.hbm %s2532_s0, 12 }
  0x3d   : > { %s403_s30 = sshll.u32 %s402_s9, 4  ;;  %s404_s30 = int_to_ptr.hbm [resolvable:$true] %s403_s30 }
  0x3e   : > { %s1705_s5 = sshra.s32 %s404_s30, 4  ;;  %s1706_s5 = int_to_ptr.hbm [resolvable:$true] %s1705_s5 }
  0x3f   : > { %s1707_s6 = scalar_lea.hbm %s1706_s5, 6  ;;  %p1713_p1 = scmp.lt.s32.totalorder %s1706_s5, %s2532_s0 }
  0x40   : > { %p1708_p0 = scmp.ne.s32.totalorder %s1706_s5, %s1707_s6  ;;  %p1714_p2 = scmp.lt.s32.totalorder %s1712_s15, %s1707_s6 }
  0x42   : > { %p1710_p4 = pnand %p1709_p13, %p1708_p0  ;;  %p1715_p12 = por %p1714_p2, %p1713_p1 }
  0x44   : > { %p1711_p8 = pneg %p1710_p4 }
  0x46   : > { %p1716_p6 = pnand %p1715_p12, %p1711_p8 }
  0x48   : > { %1719 = shalt.err (!%p1716_p6)
}
  0x49   : > { %s2501_s16 = smov 32   ;;  %s2502_s13 = smov 2  }
  0x4a   : > { %1437 = dma.hbm_to_vmem [thread:$0]  (!%p2172_p11), %s404_s30, 96, %s406_s17, %s394_s3, %s2501_s16, %s2501_s16, %s2502_s13  }
  0x4b   : > { %s2193_s5 = sadd.s32 1, %s1967_s23   ;;  %s67_s27 = ssub.s32 1, %s1967_s23 }
  0x4c   : > { %s41_s6 = ssub.s32 %s1967_s23, %s2193_s5  ;;  %s68_s28 = ssub.s32 1, %s2193_s5 }
  0x4d   : > { %p42_p1 = scmp.eq.s32.totalorder %s41_s6, 0  ;;  %s69_s12 = ssub.s32 %s67_s27, %s68_s28 }
  0x4e   : > { %s72_s9 = sadd.s32 1, %s1951_s19  ;;  %s2533_s15 = sadd.s32 1, %s1963_s22 }
  0x4f   : > { %s2203_s8 = scalar_select %p42_p1, %s1963_s22, %s2533_s15  }
  0x50   : > { %p70_p2 = scmp.eq.s32.totalorder %s69_s12, 0  ;;  %p79_p6 = scmp.ne.s32.totalorder %s1951_s19, %s1947_s18 }
  0x51   : > { %2534 = sst [smem:[#allocation37_spill]] %s2203_s8  ;;  %s415_s14 = sand.u32 1, %s1967_s23  }
  0x52   : > { %s417_s2 = sand.u32 1, %s1951_s19   ;;  %p2536_p12 = scmp.eq.s32.totalorder %s1967_s23, 0 }
  0x53   : > { %s2210_s0 = scalar_select %p70_p2, %s1951_s19, %s72_s9  }
  0x54   : > { %p81_p11 = por %p79_p6, %p2536_p12  ;;  %p2537_p0 = scmp.eq.s32.totalorder %s2082_s24, 1 }
  0x55   : > { %2535 = sst [smem:[#allocation38_spill]] %s2210_s0  ;;  %s1386_s30 = smul.u32 6, %s417_s2 }
  0x56   : > { %p2216_p13 = por %p2537_p0, %p79_p6  ;;  %s1378_s17 = smul.u32 6, %s67_s27 }
  0x57   : > { %p2539_p4 = scmp.lt.s32.totalorder %s1967_s23, 2  ;;  %s2541_s1 = sld [smem:[#allocation40_spill]] }
  0x58   : > { %s419_s15 = scalar_lea.vmem [#allocation11], %s1386_s30  ;;  %s416_s8 = scalar_lea.sflag [#allocation12], %s415_s14 }
  0x59   : > { %p2222_p8 = pnand %p2539_p4, %p81_p11  ;;  %s428_s16 = sshll.u32 %s419_s15, 4  ;;  %s429_s16 = int_to_ptr.vmem [resolvable:$true] %s428_s16 }
  0x5b   : > { %p1739_p2 = pneg %p2222_p8 }
  0x5d   : > { %s425_s9 = scalar_lea.hbm %s2541_s1, %s1378_s17  ;;  %s1742_s28 = scalar_lea.hbm %s2541_s1, 12 }
  0x5e   : > { %s426_s13 = sshll.u32 %s425_s9, 4  ;;  %s427_s13 = int_to_ptr.hbm [resolvable:$true] %s426_s13 }
  0x5f   : > { %s1735_s22 = sshra.s32 %s427_s13, 4  ;;  %s1736_s22 = int_to_ptr.hbm [resolvable:$true] %s1735_s22 }
  0x60   : > { %s1737_s2 = scalar_lea.hbm %s1736_s22, 6  ;;  %p1743_p11 = scmp.lt.s32.totalorder %s1736_s22, %s2541_s1 }
  0x61   : > { %p1738_p1 = scmp.ne.s32.totalorder %s1736_s22, %s1737_s2  ;;  %p1744_p0 = scmp.lt.s32.totalorder %s1742_s28, %s1737_s2 }
  0x63   : > { %p1740_p6 = pnand %p1739_p2, %p1738_p1  ;;  %p1745_p4 = por %p1744_p0, %p1743_p11 }
  0x65   : > { %p1741_p12 = pneg %p1740_p6 }
  0x67   : > { %p1746_p9 = pnand %p1745_p4, %p1741_p12 }
  0x69   : > { %1749 = shalt.err (!%p1746_p9)
}
  0x6a   : > { %s2542_s14 = smov 2   ;;  %s2543_s30 = smov 32  }
  0x6b   : > { %1440 = dma.hbm_to_vmem [thread:$0]  (!%p2222_p8), %s427_s13, 96, %s429_s16, %s416_s8, %s2543_s30, %s2543_s30, %s2542_s14  }
  0x6c   : > { %440 = sbr.rel (%p2100_p7) target bundleno = 1918 (0x77e), region = 52  ;;  %s2245_s0 = sand.u32 (!%p2100_p7), 1, %s1959_s21  }
  0x6d   : > { %s1387_s22 = smul.u32 (!%p2100_p7), 6, %s2245_s0  ;;  %s443_s9 = scalar_lea.sflag (!%p2100_p7), [#allocation9], %s2245_s0 }
  0x6f   : > { %s446_s15 = scalar_lea.vmem (!%p2100_p7), [#allocation8], %s1387_s22 }
  0x71   : > { %1906 = dma.done.wait (%p2152_p10), %s443_s9, 96  }
  0x72   : > { %1908 = vsyncadd (%p2152_p10), %s443_s9, 4294967200  ;;  %s2504_s26 = sand.u32 1, %s2082_s24   ;;  %s454_s16 = sand.u32 1, %s1947_s18  }
  0x73   : > { %s1388_s13 = smul.u32 6, %s454_s16  ;;  %s453_s8 = scalar_lea.sflag [#allocation12], %s2504_s26 }
  0x75   : > { %s2257_s6 = scalar_lea.vmem [#allocation11], %s1388_s13 }
  0x76   : > { %1910 = dma.done.wait (%p2095_p5), %s453_s8, 96  }
  0x77   : > { %1912 = vsyncadd (%p2095_p5), %s453_s8, 4294967200  ;;  %p2544_p7 = scmp.eq.s32.totalorder %s2082_s24, 0 }
  0x79   : > { %1914 = dma.done.wait (%p2544_p7), [#allocation12], 128   ;;  %p2545_p10 = pmov %p2544_p7 }
  0x7a   : > { %p2546_p9 = pmov %p2544_p7 }
  0x7b   : > { %1916 = vsyncadd (%p2545_p10), [#allocation12], 4294967168 }
  0x7c   : > { %1918 = dma.done.wait (%p2546_p9), [#allocation15], 256   ;;  %p2547_p8 = pmov %p2544_p7 }
  0x7d   : > { %p2548_p1 = pmov %p2544_p7 }
  0x7e   : > { %1920 = vsyncadd (%p2547_p8), [#allocation15], 4294967040 }
  0x7f   : > { %1922 = dma.done.wait (%p2548_p1), [#allocation18], 128   ;;  %p2549_p2 = pmov %p2548_p1 }
  0x80   : > { %s2275_s25 = scalar_lea.vmem [#allocation19], %s1387_s22  ;;  %s2277_s10 = scalar_lea.vmem [#allocation20], %s1388_s13 }
  0x81   : > { %1924 = vsyncadd (%p2549_p2), [#allocation18], 4294967168  ;;  %p2550_p5 = scmp.ne.s32.totalorder %s2082_s24, 0 }
  0x83   : > { %536 = sbr.rel (%p2550_p5) target bundleno = 141 (0x8d), region = 80 }
  0x88   : > { %vm537_vm0 = vcmask 123904   ;;  %v1977_v0 = vmov 0.0  }
  0x89   : > { %538 = vst.msk [vmem:[#allocation2] sm:$0x3] %vm537_vm0, %v1977_v0 }
  0x8a   : > { %539 = vst.msk [vmem:[#allocation3] sm:$0x3] %vm537_vm0, %v1977_v0 }
  0x8b   : > { %540 = vst.msk [vmem:[#allocation4] sm:$0x3] %vm537_vm0, %v1977_v0 }
  0x8c   : > { %541 = vst.msk [vmem:[#allocation5] sm:$0x3] %vm537_vm0, %v1977_v0 }
  0x8d PF: > { %v1379_v1 = vld [vmem:[#allocation13] sm:$0xff]  ;;  %v1382_v2 = vld [vmem:[#allocation17] sm:$0xff]  ;;  %v542_v3 = vld [vmem:[%s446_s15] sm:$0x3]  ;;  %vm582_vm1 = vcmask 130048   ;;  %s1978_s2 = smov 16  }
  0x8e   : > { %v543_v4 = vld [vmem:[%s446_s15 + $0x2] sm:$0x3]  ;;  %v544_v5 = vld [vmem:[%s446_s15 + $0x4] sm:$0x3]  ;;  %548 = vst [vmem:[#allocation1] ss:$4 sm:$0xff] %v542_v3  ;;  %593 = vmatpush.bf16.msra.mxu0 %v1379_v1  ;;  %729 = vmatpush.bf16.msra.mxu3 %v1382_v2 }
  0x8f   : > { %550 = vst [vmem:[#allocation1 + $0x1] ss:$4 sm:$0xff] %v543_v4  ;;  %v1381_v6 = vld [vmem:[#allocation14] sm:$0xff]  ;;  %v1380_v7 = vld [vmem:[#allocation16] sm:$0xff]  ;;  %v558_v16 = vld [vmem:[%s2257_s6 + $0x4] sm:$0x3] }
  0x90   : > { %552 = vst [vmem:[#allocation1 + $0x2] ss:$4 sm:$0xff] %v544_v5  ;;  %v634_v9 = vld [vmem:[#allocation2] sm:$0x3]  ;;  %656 = vmatpush.bf16.msra.mxu2 %v1381_v6  ;;  %623 = vmatpush.bf16.msra.mxu1 %v1380_v7  ;;  %v556_v13 = vld [vmem:[%s2257_s6] sm:$0x3] }
  0x91   : > { %v639_v12 = vpack.c.bf16 %v634_v9, %v634_v9  ;;  %v557_v14 = vld [vmem:[%s2257_s6 + $0x2] sm:$0x3]  ;;  %v635_v18 = vld [vmem:[#allocation3] sm:$0x3]  ;;  %s2551_s4 = sld [smem:[#allocation43_spill]]  ;;  %vm599_vm2 = vcmask 521216  }
  0x92   : > { %996 = vmatpush.bf16.msrb.mxu3 %v1382_v2  ;;  %v636_v8 = vld [vmem:[#allocation4] sm:$0x3]  ;;  %799 = vmatpush.bf16.msrb.mxu0 %v1381_v6  ;;  %v1536_v26 = vld [vmem:[%s2487_s7] ss:$0 sm:$0xff]  ;;  %s1979_s14 = smov 96   ;;  %s2505_s30 = smov 32  }
  0x93   : > { %v637_v10 = vld [vmem:[#allocation5] sm:$0x3]  ;;  %v712_v11 = vpack.c.bf16 %v636_v8, %v636_v8  ;;  %1349 = vmatmul.msk.bf16.vlgmr.msra.gmra.mxu2 %vm582_vm1, %v639_v12  ;;  %s1981_s22 = smov 80   ;;  %s1982_s9 = smov 112  }
  0x94   : > { %757 = vrot.lane.b32.xlu1 %v637_v10, %s1978_s2  ;;  %865 = vmatpush.bf16.msrb.mxu1 %v1382_v2  ;;  %s1983_s15 = smov [#allocation23]   ;;  %s1129_s6 = sshll.u32 %s2491_s11, 4  ;;  %s1130_s6 = int_to_ptr.hbm [resolvable:$true] %s1129_s6 }
  0x95   : > { %1355 = vmatmul.msk.bf16.vlgmr.msra.gmra.mxu3 %vm582_vm1, %v712_v11  ;;  %931 = vmatpush.bf16.msrb.mxu2 %v1381_v6  ;;  %s1127_s16 = sshll.u32 %s1983_s15, 4  ;;  %p2552_p6 = scmp.eq.s32.totalorder %s2082_s24, 1  ;;  %s1128_s16 = int_to_ptr.vmem [resolvable:$true] %s1127_s16 }
  0x96   : > { %s1093_s27 = ssub.s32 1, %s2082_s24  ;;  %s1383_s13 = smul.u32 6, %s2082_s24 }
  0x97   : > { %v553_v15 = vld.sshfl [vmem:[#allocation1] sm:$0xff pattern:$0x73625140]  ;;  %s1384_s28 = smul.u32 6, %s1093_s27  ;;  %s2554_s1 = sld [smem:[#allocation46_spill]] }
  0x98   : > { %v555_v17 = vpack.c.bf16 %v553_v15, %v553_v15  ;;  %562 = vst [vmem:[#allocation1] ss:$4 sm:$0xff] %v556_v13  ;;  %v1535_v21 = vld [vmem:[%s2551_s4] ss:$0 sm:$0xff] }
  0x99   : > { %564 = vst [vmem:[#allocation1 + $0x1] ss:$4 sm:$0xff] %v557_v14 }
  0x9a   : > { %566 = vst [vmem:[#allocation1 + $0x2] ss:$4 sm:$0xff] %v558_v16  ;;  %1339 = vmatmul.msk.bf16.vlgmr.msra.gmra.mxu0 %vm582_vm1, %v555_v17 }
  0x9c   : > { %684 = vrot.lane.b32.xlu1 %v635_v18, %s1978_s2 }
  0x9d   : > { %s1080_s4 = scalar_lea.hbm %s2554_s1, %s1383_s13 }
  0xa1   : > { %v567_v19 = vld.sshfl [vmem:[#allocation1] sm:$0xff pattern:$0x73625140] }
  0xa2   : > { %v569_v20 = vpack.c.bf16 %v567_v19, %v567_v19 }
  0xa4   : > { %1344 = vmatmul.msk.bf16.vlgmr.msra.gmra.mxu1 %vm582_vm1, %v569_v20 }
 0x106   : > { %v758_v5 = vpop.permute.xlu1 %757 }
 0x10e   : > { %v685_v9 = vpop.permute.xlu1 %684 }
 0x116   : > { %v658_v25 = vpop.f32.mrf.mxu2 }
 0x117   : > { %v595_v22 = vpop.f32.mrf.mxu0 }
 0x118   : > { %v731_v23 = vpop.f32.mrf.mxu3  ;;  %v596_v24 = vadd.f32 %v1535_v21, %v595_v22 }
 0x11a   : > { %600 = vst.msk [vmem:[#allocation6] sm:$0x3f] %vm599_vm2, %v596_v24 }
 0x11e   : > { %v660_v29 = vpop.f32.mrf.mxu2 }
 0x11f   : > { %v597_v27 = vpop.f32.mrf.mxu0 }
 0x120   : > { %v733_v28 = vpop.f32.mrf.mxu3 }
 0x121   : > { %v625_v30 = vpop.f32.mrf.mxu1  ;;  %v638_v35 = vld [vmem:[#allocation6] sm:$0x3]  ;;  %v784_v28 = vld [vmem:[#allocation6 + $0x2] sm:$0x3] }
 0x122   : > { %v626_v31 = vadd.f32 %v1536_v26, %v625_v30  ;;  %v662_v36 = vadd.f32 %v658_v25, %v638_v35 }
 0x124   : > { %629 = vst.msk [vmem:[#allocation7] sm:$0x3f] %vm599_vm2, %v626_v31  ;;  %v1350_v40 = vmul.f32 -1.442695, %v662_v36 }
 0x129   : > { %v627_v32 = vpop.f32.mrf.mxu1 }
 0x12b   : > { %v711_v33 = vld [vmem:[#allocation7 + $0x4] sm:$0x3] }
 0x12c   : > { %v735_v34 = vadd.f32 %v731_v23, %v711_v33  ;;  %v850_v23 = vld [vmem:[#allocation7 + $0x2] sm:$0x3] }
 0x12e   : > { %1537 = vtanh.f32 %v735_v34  ;;  %v1356_v39 = vmul.f32 -1.442695, %v735_v34 }
 0x12f   : > { %1539 = vtanh.f32 %v662_v36 }
 0x130   : > { %1541 = vpow2.f32 %v1356_v39 }
 0x131   : > { %1543 = vpow2.f32 %v1350_v40 }
 0x134   : > { %v1538_v37 = vpop.eup %1537 }
 0x135   : > { %762 = vrot.lane.b32.xlu0 %v1538_v37, %s1979_s14  ;;  %v1540_v38 = vpop.eup %1539 }
 0x136   : > { %v1542_v41 = vpop.eup %1541 }
 0x137   : > { %v739_v42 = vadd.f32 1.0, %v1542_v41  ;;  %v1544_v43 = vpop.eup %1543 }
 0x138   : > { %v666_v44 = vadd.f32 1.0, %v1544_v43 }
 0x139   : > { %1545 = vrcp.f32 %v739_v42  ;;  %v751_v53 = vand.u32 2147483648, %v739_v42  ;;  %vm745_vm4 = vweird.f32 %v739_v42  ;;  %v749_v54 = vand.u32 2147483647, %v739_v42 }
 0x13a   : > { %1547 = vrcp.f32 %v666_v44  ;;  %vm672_vm7 = vweird.f32 %v666_v44  ;;  %v678_v59 = vand.u32 2147483648, %v666_v44  ;;  %v676_v62 = vand.u32 2147483647, %v666_v44 }
 0x13b   : > { %v752_v57 = vor.u32 1.1754944e-38, %v751_v53  ;;  %vm750_vm6 = vcmp.eq.f32.partialorder %v749_v54, 8.507059e+37 }
 0x13c   : > { %v679_v0 = vor.u32 1.1754944e-38, %v678_v59  ;;  %vm677_vm10 = vcmp.eq.f32.partialorder %v676_v62, 8.507059e+37 }
 0x13d   : > { %689 = vrot.lane.b32.xlu0 %v1540_v38, %s1979_s14 }
 0x13f   : > { %v1546_v45 = vpop.eup %1545 }
 0x140   : > { %v741_v46 = vmul.f32 %v1546_v45, %v739_v42  ;;  %v1548_v48 = vpop.eup %1547  ;;  %vm746_vm3 = vweird.f32 %v1546_v45 }
 0x141   : > { %v668_v50 = vmul.f32 %v1548_v48, %v666_v44  ;;  %vm747_vm5 = vmor %vm745_vm4, %vm746_vm3  ;;  %vm673_vm8 = vweird.f32 %v1548_v48 }
 0x142   : > { %v742_v47 = vsub.f32 1.0, %v741_v46  ;;  %vm674_vm9 = vmor %vm672_vm7, %vm673_vm8 }
 0x143   : > { %v669_v52 = vsub.f32 1.0, %v668_v50 }
 0x144   : > { %v743_v49 = vmul.f32 %v1546_v45, %v742_v47 }
 0x145   : > { %v670_v56 = vmul.f32 %v1548_v48, %v669_v52 }
 0x146   : > { %v744_v51 = vadd.f32 %v1546_v45, %v743_v49 }
 0x147   : > { %v671_v61 = vadd.f32 %v1548_v48, %v670_v56 }
 0x148   : > { %v748_v55 = vsel %vm747_vm5, %v1546_v45, %v744_v51 }
 0x149   : > { %v753_v58 = vsel %vm750_vm6, %v752_v57, %v748_v55  ;;  %v675_v1 = vsel %vm674_vm9, %v1548_v48, %v671_v61 }
 0x14a   : > { %v680_v2 = vsel %vm677_vm10, %v679_v0, %v675_v1  ;;  %v760_v6 = vmul.f32 %v758_v5, %v753_v58 }
 0x14b   : > { %v687_v10 = vmul.f32 %v685_v9, %v680_v2 }
 0x1a7   : > { %v763_v60 = vpop.permute.xlu0 %762 }
 0x1a8   : > { %v765_v63 = vmul.f32 %v763_v60, %v753_v58 }
 0x1aa   : > { %767 = vrot.lane.b32.xlu2 %v765_v63, %s1978_s2 }
 0x1af   : > { %v690_v3 = vpop.permute.xlu0 %689 }
 0x1b0   : > { %v692_v4 = vmul.f32 %v690_v3, %v680_v2 }
 0x1b2   : > { %694 = vrot.lane.b32.xlu2 %v692_v4, %s1978_s2 }
 0x204   : > { %v768_v7 = vpop.permute.xlu2 %767 }
 0x205   : > { %v2300_v8 = vadd.f32 %v768_v7, %v760_v6 }
 0x207   : > { %1549 = vtanh.f32 %v2300_v8 }
 0x20c   : > { %v695_v11 = vpop.permute.xlu2 %694 }
 0x20d   : > { %v1550_v12 = vpop.eup %1549  ;;  %v2303_v13 = vadd.f32 %v695_v11, %v687_v10 }
 0x20e   : > { %773 = vrot.lane.b32.xlu0 %v1550_v12, %s2505_s30 }
 0x20f   : > { %1551 = vtanh.f32 %v2303_v13 }
 0x215   : > { %v1552_v14 = vpop.eup %1551 }
 0x216   : > { %700 = vrot.lane.b32.xlu1 %v1552_v14, %s2505_s30 }
 0x280   : > { %v774_v15 = vpop.permute.xlu0 %773 }
 0x281   : > { %v2308_v16 = vmul.f32 %v774_v15, %v753_v58  ;;  %v981_v15 = vld [vmem:[#allocation7] sm:$0x3] }
 0x283   : > { %v851_v17 = vpack.c.bf16 %v2308_v16, %v2308_v16 }
 0x285   : > { %853 = vrot.lane.b32.xlu2 %v851_v17, %s1981_s22 }
 0x288   : > { %v701_v18 = vpop.permute.xlu1 %700 }
 0x289   : > { %v2313_v19 = vmul.f32 %v701_v18, %v680_v2 }
 0x28b   : > { %v785_v20 = vpack.c.bf16 %v2313_v19, %v2313_v19 }
 0x28d   : > { %787 = vrot.lane.b32.xlu0 %v785_v20, %s1981_s22  ;;  %v916_v20 = vld [vmem:[#allocation6 + $0x4] sm:$0x3] }
 0x2df   : > { %v854_v21 = vpop.permute.xlu2 %853 }
 0x2e0   : > { %1361 = vmatmul.msk.bf16.vlgmr.msrb.gmra.mxu1 %vm582_vm1, %v854_v21 }
 0x2ff   : > { %v788_v22 = vpop.permute.xlu0 %787 }
 0x300   : > { %1358 = vmatmul.msk.bf16.vlgmr.msrb.gmra.mxu0 %vm582_vm1, %v788_v22 }
 0x35d   : > { %v867_v24 = vpop.f32.mrf.mxu1 }
 0x35e   : > { %v871_v25 = vadd.f32 %v867_v24, %v850_v23 }
 0x360   : > { %1553 = vtanh.f32 %v871_v25  ;;  %v1362_v33 = vmul.f32 -1.442695, %v871_v25 }
 0x365   : > { %v869_v26 = vpop.f32.mrf.mxu1 }
 0x366   : > { %v1554_v27 = vpop.eup %1553 }
 0x367   : > { %894 = vrot.lane.b32.xlu1 %v1554_v27, %s1979_s14 }
 0x37d   : > { %v801_v29 = vpop.f32.mrf.mxu0 }
 0x37e   : > { %v805_v30 = vadd.f32 %v801_v29, %v784_v28 }
 0x380   : > { %1555 = vtanh.f32 %v805_v30  ;;  %v1359_v34 = vmul.f32 -1.442695, %v805_v30 }
 0x381   : > { %1557 = vpow2.f32 %v1362_v33 }
 0x382   : > { %1559 = vpow2.f32 %v1359_v34 }
 0x385   : > { %v803_v31 = vpop.f32.mrf.mxu0 }
 0x386   : > { %v1556_v32 = vpop.eup %1555 }
 0x387   : > { %828 = vrot.lane.b32.xlu2 %v1556_v32, %s1979_s14  ;;  %v1558_v35 = vpop.eup %1557 }
 0x388   : > { %v875_v36 = vadd.f32 1.0, %v1558_v35  ;;  %v1560_v37 = vpop.eup %1559 }
 0x389   : > { %v809_v38 = vadd.f32 1.0, %v1560_v37 }
 0x38a   : > { %1561 = vrcp.f32 %v875_v36  ;;  %v887_v47 = vand.u32 2147483648, %v875_v36  ;;  %vm881_vm12 = vweird.f32 %v875_v36  ;;  %v885_v48 = vand.u32 2147483647, %v875_v36 }
 0x38b   : > { %1563 = vrcp.f32 %v809_v38  ;;  %v821_v56 = vand.u32 2147483648, %v809_v38  ;;  %vm815_vm0 = vweird.f32 %v809_v38  ;;  %v819_v57 = vand.u32 2147483647, %v809_v38 }
 0x38c   : > { %v888_v51 = vor.u32 1.1754944e-38, %v887_v47  ;;  %vm886_vm14 = vcmp.eq.f32.partialorder %v885_v48, 8.507059e+37 }
 0x38d   : > { %v822_v59 = vor.u32 1.1754944e-38, %v821_v56  ;;  %vm820_vm3 = vcmp.eq.f32.partialorder %v819_v57, 8.507059e+37 }
 0x390   : > { %v1562_v39 = vpop.eup %1561 }
 0x391   : > { %v877_v40 = vmul.f32 %v1562_v39, %v875_v36  ;;  %v1564_v42 = vpop.eup %1563  ;;  %vm882_vm11 = vweird.f32 %v1562_v39 }
 0x392   : > { %v811_v44 = vmul.f32 %v1564_v42, %v809_v38  ;;  %vm883_vm13 = vmor %vm881_vm12, %vm882_vm11  ;;  %vm816_vm15 = vweird.f32 %v1564_v42  ;;  %vm708_vm11 = vcmask 123904  }
 0x393   : > { %v878_v41 = vsub.f32 1.0, %v877_v40  ;;  %vm817_vm2 = vmor %vm815_vm0, %vm816_vm15 }
 0x394   : > { %v812_v46 = vsub.f32 1.0, %v811_v44 }
 0x395   : > { %v879_v43 = vmul.f32 %v1562_v39, %v878_v41 }
 0x396   : > { %v813_v50 = vmul.f32 %v1564_v42, %v812_v46 }
 0x397   : > { %v880_v45 = vadd.f32 %v1562_v39, %v879_v43 }
 0x398   : > { %v814_v55 = vadd.f32 %v1564_v42, %v813_v50 }
 0x399   : > { %v884_v49 = vsel %vm883_vm13, %v1562_v39, %v880_v45 }
 0x39a   : > { %v889_v52 = vsel %vm886_vm14, %v888_v51, %v884_v49  ;;  %v818_v58 = vsel %vm817_vm2, %v1564_v42, %v814_v55 }
 0x39b   : > { %v823_v61 = vsel %vm820_vm3, %v822_v59, %v818_v58  ;;  %v892_v63 = vmul.f32 %v889_v52, %v2300_v8 }
 0x39c   : > { %v826_v2 = vmul.f32 %v823_v61, %v2303_v13 }
 0x3d9   : > { %v895_v53 = vpop.permute.xlu1 %894 }
 0x3da   : > { %v897_v54 = vmul.f32 %v895_v53, %v889_v52 }
 0x3dc   : > { %899 = vrot.lane.b32.xlu0 %v897_v54, %s1978_s2 }
 0x3e1   : > { %v829_v60 = vpop.permute.xlu2 %828 }
 0x3e2   : > { %v831_v62 = vmul.f32 %v829_v60, %v823_v61 }
 0x3e4   : > { %833 = vrot.lane.b32.xlu1 %v831_v62, %s1978_s2 }
 0x44e   : > { %v900_v0 = vpop.permute.xlu0 %899 }
 0x44f   : > { %v2325_v1 = vadd.f32 %v900_v0, %v892_v63 }
 0x451   : > { %1565 = vtanh.f32 %v2325_v1 }
 0x456   : > { %v834_v3 = vpop.permute.xlu1 %833 }
 0x457   : > { %v1566_v4 = vpop.eup %1565  ;;  %v2329_v5 = vadd.f32 %v834_v3, %v826_v2 }
 0x458   : > { %905 = vrot.lane.b32.xlu2 %v1566_v4, %s2505_s30 }
 0x459   : > { %1567 = vtanh.f32 %v2329_v5 }
 0x45f   : > { %v1568_v6 = vpop.eup %1567 }
 0x460   : > { %839 = vrot.lane.b32.xlu0 %v1568_v6, %s2505_s30 }
 0x4b2   : > { %v906_v7 = vpop.permute.xlu2 %905 }
 0x4b3   : > { %v2334_v8 = vmul.f32 %v906_v7, %v889_v52 }
 0x4b5   : > { %v982_v9 = vpack.c.bf16 %v2334_v8, %v2334_v8 }
 0x4b7   : > { %984 = vrot.lane.b32.xlu1 %v982_v9, %s1981_s22 }
 0x4d2   : > { %v840_v10 = vpop.permute.xlu0 %839 }
 0x4d3   : > { %v2339_v11 = vmul.f32 %v840_v10, %v823_v61 }
 0x4d5   : > { %v917_v12 = vpack.c.bf16 %v2339_v11, %v2339_v11 }
 0x4d7   : > { %919 = vrot.lane.b32.xlu2 %v917_v12, %s1981_s22 }
 0x529   : > { %v985_v13 = vpop.permute.xlu1 %984 }
 0x52a   : > { %1367 = vmatmul.msk.bf16.vlgmr.msrb.gmra.mxu3 %vm582_vm1, %v985_v13 }
 0x531   : > { %v920_v14 = vpop.permute.xlu2 %919 }
 0x532   : > { %1364 = vmatmul.msk.bf16.vlgmr.msrb.gmra.mxu2 %vm582_vm1, %v920_v14 }
 0x5ad   : > { %v998_v17 = vpop.f32.mrf.mxu3 }
 0x5ae   : > { %v1002_v18 = vadd.f32 %v998_v17, %v981_v15 }
 0x5b0   : > { %1569 = vtanh.f32 %v1002_v18  ;;  %v1368_v27 = vmul.f32 -1.442695, %v1002_v18 }
 0x5b5   : > { %v933_v21 = vpop.f32.mrf.mxu2  ;;  %v1000_v22 = vpop.f32.mrf.mxu3 }
 0x5b6   : > { %v1570_v23 = vpop.eup %1569  ;;  %v937_v24 = vadd.f32 %v933_v21, %v916_v20 }
 0x5b7   : > { %1025 = vrot.lane.b32.xlu0 %v1570_v23, %s1979_s14 }
 0x5b8   : > { %1571 = vtanh.f32 %v937_v24  ;;  %v1365_v28 = vmul.f32 -1.442695, %v937_v24 }
 0x5b9   : > { %1573 = vpow2.f32 %v1368_v27 }
 0x5ba   : > { %1575 = vpow2.f32 %v1365_v28 }
 0x5bd   : > { %v935_v25 = vpop.f32.mrf.mxu2 }
 0x5be   : > { %v1572_v26 = vpop.eup %1571 }
 0x5bf   : > { %960 = vrot.lane.b32.xlu1 %v1572_v26, %s1979_s14  ;;  %v1574_v29 = vpop.eup %1573  ;;  %s2553_s14 = sld [smem:[#allocation47_spill]] }
 0x5c0   : > { %v1006_v30 = vadd.f32 1.0, %v1574_v29  ;;  %v1576_v31 = vpop.eup %1575 }
 0x5c1   : > { %v941_v32 = vadd.f32 1.0, %v1576_v31 }
 0x5c2   : > { %1577 = vrcp.f32 %v1006_v30  ;;  %v1018_v41 = vand.u32 2147483648, %v1006_v30  ;;  %vm1012_vm4 = vweird.f32 %v1006_v30  ;;  %v1016_v42 = vand.u32 2147483647, %v1006_v30 }
 0x5c3   : > { %1579 = vrcp.f32 %v941_v32  ;;  %v953_v50 = vand.u32 2147483648, %v941_v32  ;;  %vm947_vm8 = vweird.f32 %v941_v32  ;;  %v951_v51 = vand.u32 2147483647, %v941_v32 }
 0x5c4   : > { %v1019_v45 = vor.u32 1.1754944e-38, %v1018_v41  ;;  %vm1017_vm6 = vcmp.eq.f32.partialorder %v1016_v42, 8.507059e+37 }
 0x5c5   : > { %v954_v53 = vor.u32 1.1754944e-38, %v953_v50  ;;  %vm952_vm10 = vcmp.eq.f32.partialorder %v951_v51, 8.507059e+37 }
 0x5c8   : > { %v1578_v33 = vpop.eup %1577 }
 0x5c9   : > { %v1008_v34 = vmul.f32 %v1578_v33, %v1006_v30  ;;  %v1580_v36 = vpop.eup %1579  ;;  %vm1013_vm1 = vweird.f32 %v1578_v33 }
 0x5ca   : > { %v943_v38 = vmul.f32 %v1580_v36, %v941_v32  ;;  %vm1014_vm5 = vmor %vm1012_vm4, %vm1013_vm1  ;;  %vm948_vm7 = vweird.f32 %v1580_v36 }
 0x5cb   : > { %v1009_v35 = vsub.f32 1.0, %v1008_v34  ;;  %vm949_vm9 = vmor %vm947_vm8, %vm948_vm7 }
 0x5cc   : > { %v944_v40 = vsub.f32 1.0, %v943_v38 }
 0x5cd   : > { %v1010_v37 = vmul.f32 %v1578_v33, %v1009_v35 }
 0x5ce   : > { %v945_v44 = vmul.f32 %v1580_v36, %v944_v40 }
 0x5cf   : > { %v1011_v39 = vadd.f32 %v1578_v33, %v1010_v37 }
 0x5d0   : > { %v946_v49 = vadd.f32 %v1580_v36, %v945_v44 }
 0x5d1   : > { %v1015_v43 = vsel %vm1014_vm5, %v1578_v33, %v1011_v39 }
 0x5d2   : > { %v1020_v47 = vsel %vm1017_vm6, %v1019_v45, %v1015_v43  ;;  %v950_v52 = vsel %vm949_vm9, %v1580_v36, %v946_v49 }
 0x5d3   : > { %v955_v54 = vsel %vm952_vm10, %v954_v53, %v950_v52  ;;  %v1023_v57 = vmul.f32 %v1020_v47, %v2325_v1 }
 0x629   : > { %v1026_v46 = vpop.permute.xlu0 %1025 }
 0x62a   : > { %v1028_v48 = vmul.f32 %v1026_v46, %v1020_v47 }
 0x62c   : > { %1030 = vrot.lane.b32.xlu2 %v1028_v48, %s1978_s2 }
 0x631   : > { %v961_v55 = vpop.permute.xlu1 %960 }
 0x632   : > { %v963_v56 = vmul.f32 %v961_v55, %v955_v54 }
 0x634   : > { %965 = vrot.lane.b32.xlu0 %v963_v56, %s1978_s2  ;;  %s1984_s2 = smov 2  }
 0x63c   : > { %778 = vrot.lane.b32.xlu0 %v2308_v16, %s1981_s22  ;;  %v958_v16 = vmul.f32 %v955_v54, %v2329_v5 }
 0x644   : > { %705 = vrot.lane.b32.xlu0 %v2313_v19, %s1981_s22 }
 0x686   : > { %v1031_v58 = vpop.permute.xlu2 %1030 }
 0x687   : > { %v1033_v59 = vadd.f32 %v1031_v58, %v1023_v57 }
 0x689   : > { %1581 = vtanh.f32 %v1033_v59 }
 0x68f   : > { %v1582_v60 = vpop.eup %1581 }
 0x690   : > { %1036 = vrot.lane.b32.xlu1 %v1582_v60, %s2505_s30 }
 0x698   : > { %910 = vrot.lane.b32.xlu1 %v2334_v8, %s1981_s22 }
 0x6a0   : > { %844 = vrot.lane.b32.xlu1 %v2339_v11, %s1981_s22 }
 0x6a6   : > { %v966_v61 = vpop.permute.xlu0 %965 }
 0x6a7   : > { %v968_v19 = vadd.f32 %v966_v61, %v958_v16 }
 0x6a8   : > { %1053 = vrot.lane.b32.xlu1 %v1033_v59, %s1982_s9 }
 0x6a9   : > { %1583 = vtanh.f32 %v968_v19  ;;  %1047 = vrot.lane.b32.xlu0 %v968_v19, %s1982_s9  ;;  %s1099_s9 = sshll.u32 %s2277_s10, 4  ;;  %s1100_s9 = int_to_ptr.vmem [resolvable:$true] %s1099_s9 }
 0x6ae   : > { %v779_v62 = vpop.permute.xlu0 %778 }
 0x6af   : > { %v1584_v63 = vpop.eup %1583  ;;  %1357 = vst.msk [vmem:[%s2277_s10 + $0x4] sm:$0x3] %vm708_vm11, %v779_v62 }
 0x6b0   : > { %971 = vrot.lane.b32.xlu2 %v1584_v63, %s2505_s30 }
 0x6b6   : > { %v706_v0 = vpop.permute.xlu0 %705 }
 0x6b7   : > { %709 = vst.msk [vmem:[%s2275_s25] sm:$0x3] %vm708_vm11, %v706_v0 }
 0x702   : > { %v1037_v1 = vpop.permute.xlu1 %1036 }
 0x703   : > { %v1039_v2 = vmul.f32 %v1037_v1, %v1020_v47 }
 0x705   : > { %1041 = vrot.lane.b32.xlu2 %v1039_v2, %s1981_s22 }
 0x70a   : > { %v972_v3 = vpop.permute.xlu2 %971  ;;  %v911_v4 = vpop.permute.xlu1 %910 }
 0x70b   : > { %v974_v5 = vmul.f32 %v972_v3, %v955_v54  ;;  %1363 = vst.msk [vmem:[%s2277_s10 + $0x2] sm:$0x3] %vm708_vm11, %v911_v4 }
 0x70d   : > { %976 = vrot.lane.b32.xlu2 %v974_v5, %s1981_s22  ;;  %s1098_s22 = scalar_lea.hbm %s2553_s14, %s1384_s28 }
 0x70e   : > { %s1101_s15 = sshll.u32 %s1098_s22, 4  ;;  %s1813_s22 = scalar_lea.hbm %s2553_s14, 12  ;;  %s1102_s15 = int_to_ptr.hbm [resolvable:$true] %s1101_s15 }
 0x70f   : > { %s1807_s27 = sshra.s32 %s1102_s15, 4  ;;  %s1808_s27 = int_to_ptr.hbm [resolvable:$true] %s1807_s27 }
 0x710   : > { %s1809_s12 = scalar_lea.hbm %s1808_s27, 6  ;;  %p1814_p4 = scmp.lt.s32.totalorder %s1808_s27, %s2553_s14 }
 0x711   : > { %p1810_p12 = scmp.ne.s32.totalorder %s1808_s27, %s1809_s12  ;;  %p1815_p7 = scmp.lt.s32.totalorder %s1813_s22, %s1809_s12 }
 0x712   : > { %v845_v6 = vpop.permute.xlu1 %844 }
 0x713   : > { %1360 = vst.msk [vmem:[%s2275_s25 + $0x2] sm:$0x3] %vm708_vm11, %v845_v6  ;;  %p1811_p11 = pnand %p1810_p12, %p2216_p13  ;;  %p1816_p10 = por %p1815_p7, %p1814_p4 }
 0x715   : > { %p1812_p0 = pneg %p1811_p11 }
 0x717   : > { %p1817_p9 = pnand %p1816_p10, %p1812_p0 }
 0x71a   : > { %v1054_v7 = vpop.permute.xlu1 %1053 }
 0x71b   : > { %1056 = vst.msk [vmem:[#allocation5] sm:$0x3] %vm708_vm11, %v1054_v7  ;;  %v1048_v8 = vpop.permute.xlu0 %1047 }
 0x71c   : > { %1062 = vst.msk [vmem:[#allocation23 + $0x2] sm:$0x3] %vm708_vm11, %v1054_v7 }
 0x71d   : > { %1050 = vst.msk [vmem:[#allocation3] sm:$0x3] %vm708_vm11, %v1048_v8 }
 0x71e   : > { %1060 = vst.msk [vmem:[#allocation23] sm:$0x3] %vm708_vm11, %v1048_v8 }
 0x71f   : > { %1414 = dma.vmem_to_hbm [thread:$0]  (%p2552_p6), %s1128_s16, 64, %s1130_s6, [#allocation24], %s2505_s30, %s2505_s30, %s1984_s2  }
 0x720   : > { %s2555_s16 = sand.u32 1, %s2082_s24  }
 0x721   : > { %s1069_s6 = scalar_lea.sflag [#allocation21], %s2555_s16 }
 0x75f   : > { %v1042_v9 = vpop.permute.xlu2 %1041 }
 0x760   : > { %1044 = vst.msk [vmem:[%s2277_s10] sm:$0x3] %vm708_vm11, %v1042_v9 }
 0x761   : > { %1051 = vst.msk [vmem:[#allocation4] sm:$0x3] %vm708_vm11, %v1042_v9 }
 0x762   : > { %1820 = shalt.err (!%p1817_p9)
}
 0x763   : > { %s2556_s26 = smov 32   ;;  %1059 = vst.msk [vmem:[#allocation22 + $0x2] sm:$0x3] %vm708_vm11, %v1042_v9  ;;  %s1081_s13 = sshll.u32 %s2275_s25, 4  ;;  %s1082_s13 = int_to_ptr.vmem [resolvable:$true] %s1081_s13 }
 0x764   : > { %1410 = dma.vmem_to_hbm [thread:$0]  (%p2216_p13), %s1100_s9, 96, %s1102_s15, %s1069_s6, %s2556_s26, %s2556_s26, %s1984_s2  }
 0x765   : > { %s1083_s8 = sshll.u32 %s1080_s4, 4  ;;  %s1985_s30 = smov [#allocation22]   ;;  %s1084_s8 = int_to_ptr.hbm [resolvable:$true] %s1083_s8 }
 0x766   : > { %s1113_s16 = sshll.u32 %s1985_s30, 4  ;;  %s2557_s28 = sld [smem:[#allocation48_spill]]  ;;  %s1114_s16 = int_to_ptr.vmem [resolvable:$true] %s1113_s16 }
 0x767   : > { %v977_v10 = vpop.permute.xlu2 %976  ;;  %s1064_s3 = scalar_lea.sflag [#allocation10], %s2245_s0  ;;  %s1835_s9 = sshra.s32 %s1084_s8, 4  ;;  %s1836_s9 = int_to_ptr.hbm [resolvable:$true] %s1835_s9 }
 0x768   : > { %1366 = vst.msk [vmem:[%s2275_s25 + $0x4] sm:$0x3] %vm708_vm11, %v977_v10  ;;  %s1837_s4 = scalar_lea.hbm %s1836_s9, 6  ;;  %s1841_s22 = scalar_lea.hbm %s2554_s1, 12 }
 0x769   : > { %1045 = vst.msk [vmem:[#allocation2] sm:$0x3] %vm708_vm11, %v977_v10  ;;  %p1838_p13 = scmp.ne.s32.totalorder %s1836_s9, %s1837_s4  ;;  %p1842_p2 = scmp.lt.s32.totalorder %s1836_s9, %s2554_s1 }
 0x76a   : > { %p1843_p5 = scmp.lt.s32.totalorder %s1841_s22, %s1837_s4 }
 0x76b   : > { %p1839_p8 = pnand %p1838_p13, %p2142_p3 }
 0x76c   : > { %s1115_s17 = sshll.u32 %s2557_s28, 4  ;;  %p1844_p6 = por %p1843_p5, %p1842_p2  ;;  %s1116_s17 = int_to_ptr.hbm [resolvable:$true] %s1115_s17 }
 0x76d   : > { %p1840_p1 = pneg %p1839_p8 }
 0x76f   : > { %p1845_p12 = pnand %p1844_p6, %p1840_p1 }
 0x771   : > { %1848 = shalt.err (!%p1845_p12)
}
 0x772   : > { %1409 = dma.vmem_to_hbm [thread:$0]  (%p2142_p3), %s1082_s13, 96, %s1084_s8, %s1064_s3, %s2556_s26, %s2556_s26, %s1984_s2   ;;  %1057 = vst.msk [vmem:[#allocation22] sm:$0x3] %vm708_vm11, %v977_v10 }
 0x773   : > { %p2558_p11 = scmp.eq.s32.totalorder %s2082_s24, 1 }
 0x775   : > { %1412 = dma.vmem_to_hbm [thread:$0]  (%p2558_p11), %s1114_s16, 64, %s1116_s17, [#allocation21], %s2556_s26, %s2556_s26, %s1984_s2  }
 0x776   : > { %p2559_p0 = pmov %p2558_p11 }
 0x778   : > { %1926 = dma.done.wait (%p2559_p0), [#allocation21], 64   ;;  %p2560_p4 = pmov %p2559_p0 }
 0x779   : > { %p2561_p7 = pmov %p2559_p0 }
 0x77a   : > { %1928 = vsyncadd (%p2560_p4), [#allocation21], 4294967232 }
 0x77b   : > { %1930 = dma.done.wait (%p2561_p7), [#allocation24], 64   ;;  %p2562_p10 = pmov %p2559_p0 }
 0x77d   : > { %1932 = vsyncadd (%p2562_p10), [#allocation24], 4294967232 }
 0x77e PF: > { %s2563_s29 = sld [smem:[#allocation35_spill]]  ;;  %s1154_s0 = sand.u32 1, %s1955_s20  }
 0x77f   : > { %p2565_p9 = scmp.ge.s32.totalorder %s1967_s23, 2  ;;  %s1155_s25 = scalar_lea.sflag [#allocation10], %s1154_s0 }
 0x784   : > { %p2564_p3 = scmp.ne.s32.totalorder %s2563_s29, 0 }
 0x786   : > { %p1442_p13 = pnand %p2565_p9, %p2564_p3 }
 0x788   : > { %p1443_p8 = pneg %p1442_p13 }
 0x78a   : > { %1934 = dma.done.wait (%p1443_p8), %s1155_s25, 96  }
 0x78b   : > { %1936 = vsyncadd (%p1443_p8), %s1155_s25, 4294967200  ;;  %s2566_s2 = sadd.s32 4294967294, %s1967_s23   ;;  %s2567_s26 = sld [smem:[#allocation36_spill]] }
 0x78c   : > { %s1164_s13 = sand.u32 1, %s2566_s2   ;;  %p2569_p2 = pmov %p2565_p9 }
 0x78d   : > { %s1165_s24 = scalar_lea.sflag [#allocation21], %s1164_s13 }
 0x791   : > { %p2568_p1 = scmp.ne.s32.totalorder %s2567_s26, 0 }
 0x793   : > { %p1445_p5 = pnand %p2569_p2, %p2568_p1 }
 0x795   : > { %p1446_p6 = pneg %p1445_p5 }
 0x797   : > { %1938 = dma.done.wait (%p1446_p6), %s1165_s24, 96  }
 0x798   : > { %1940 = vsyncadd (%p1446_p6), %s1165_s24, 4294967200  ;;  %s2570_s20 = sld [smem:[#allocation38_spill]]  ;;  %p34_p12 = scmp.ge.s32.totalorder %s2193_s5, 4  }
 0x799   : > { %s2571_s8 = sld [smem:[#allocation34_spill]]  ;;  %s2573_s17 = smov %s1947_s18 }
 0x79a   : > { %s2572_s22 = sld [smem:[#allocation37_spill]]  ;;  %s2574_s18 = smov %s1951_s19 }
 0x79b   : > { %s2578_s23 = smov %s2193_s5  ;;  %36 = sbr.rel (!%p34_p12) target bundleno = 25 (0x19), region = 177 }
 0x79e   : > { %s2575_s19 = smov %s2570_s20  ;;  %s2576_s20 = smov %s1959_s21 }
 0x79f   : > { %s2577_s21 = smov %s2571_s8 }
 0x7a0   :  { %1171 = vsyncpa [#allocation9], 1 }
 0x7a1   :  { %1173 = vsyncpa [#allocation9 + $0x1], 1 }
 0x7a2   :  { %1174 = vsyncpa [#allocation12], 1 }
 0x7a3   :  { %1176 = vsyncpa [#allocation12 + $0x1], 1 }
 0x7a4   :  { %1177 = vsyncpa [#allocation15], 1 }
 0x7a5   :  { %1178 = vsyncpa [#allocation18], 1 }
 0x7a6   :  { %1179 = vsyncpa [#allocation10], 1 }
 0x7a7   :  { %1181 = vsyncpa [#allocation10 + $0x1], 1 }
 0x7a8   :  { %1182 = vsyncpa [#allocation21], 1 }
 0x7a9   :  { %1184 = vsyncpa [#allocation21 + $0x1], 1 }
 0x7aa   :  { %1185 = vsyncpa [#allocation24], 1 }

</bundles_post_ra>
